<compile_context>
chip_gen: v5e
topology: v5e:2x2
jax: 0.10.0
libtpu: 0.0.40
codegen_flags: <defaults>
</compile_context>

<pallas_src>
import functools

import jax
import jax.numpy as jnp
from jax.experimental import pallas as pl
from jax.experimental.pallas import tpu as pltpu

BN_EPS = 1e-5


def _dense_block_kernel(x_ref, wstack_ref, w2b_ref, wo_ref, cp_ref,
                        o_ref, pad_ref, *, H, W, PAD):
    """One grid step = one batch element, entirely in VMEM.

    x_ref      : (1, Cin_p, HW)       input, channels on sublanes, HW on lanes
    wstack_ref : (2*Cout, 25*Cin_p)   [w1 ; w2_x-part] as im2col matrices
    w2b_ref    : (Cout, 25*Cout)      w2 x1-part as im2col matrix
    wo_ref     : (Cout, Cin_p+2*Cout) 1x1 outconv weight
    cp_ref     : (Cout, 8)            [s1 t1 a1 s2 t2 a2 bo 0] per-channel params
    o_ref      : (1, Cout, HW)        lane-dense output slab
    pad_ref    : (R, HW + 2*PAD)      zero-padded flat scratch for tap shifts
    """
    HW = H * W
    Cout = o_ref.shape[1]
    f32 = jnp.float32

    # Per-channel folded parameters (broadcast along the lane/spatial axis).
    s1, t1, a1 = cp_ref[:, 0:1], cp_ref[:, 1:2], cp_ref[:, 2:3]
    s2, t2, a2 = cp_ref[:, 3:4], cp_ref[:, 4:5], cp_ref[:, 5:6]
    bo = cp_ref[:, 6:7]

    # Column-validity masks (one per dx tap). Row overflow lands in the zero
    # halo bands of the scratch, so no row mask is needed.
    col = jax.lax.broadcasted_iota(jnp.int32, (1, HW), 1) % W
    col_ok = {sx: (col + sx >= 0) & (col + sx < W) for sx in range(-2, 3)}

    # Zero only the two halo bands; the interior is fully overwritten below.
    nrows = pad_ref.shape[0]
    pad_ref[:, 0:PAD] = jnp.zeros((nrows, PAD), f32)
    pad_ref[:, PAD + HW:] = jnp.zeros((nrows, PAD), f32)

    def patches(flat):
        """flat (C, HW) -> im2col slab (25*C, HW). Taps = lane-offset slices."""
        C = flat.shape[0]
        pad_ref[0:C, PAD:PAD + HW] = flat
        taps = []
        for sy in range(-2, 3):
            for sx in range(-2, 3):
                start = PAD + sy * W + sx          # static lane offset
                win = pad_ref[0:C, start:start + HW]
                taps.append(jnp.where(col_ok[sx], win, 0.0))
        return jnp.concatenate(taps, axis=0)

    def prelu(y, a):
        return jnp.maximum(y, 0.0) + a * jnp.minimum(y, 0.0)

    x = x_ref[0]                                               # (Cin_p, HW)

    # block1 conv + the x-channel half of block2's conv: one K=25*Cin_p matmul.
    p_x = patches(x)                                           # (25*Cin_p, HW)
    acc12 = jnp.dot(wstack_ref[...], p_x, preferred_element_type=f32)
    x1 = prelu(acc12[:Cout] * s1 + t1, a1)                     # BN1 folded

    # x1-channel half of block2's conv: one K=25*Cout matmul.
    p_x1 = patches(x1)                                         # (25*Cout, HW)
    acc2 = acc12[Cout:] + jnp.dot(w2b_ref[...], p_x1, preferred_element_type=f32)
    x3 = prelu(acc2 * s2 + t2, a2)                             # BN2 folded

    # 1x1 outconv over cat(x, x1, x3): a single K=Cin_p+2*Cout matmul.
    feats = jnp.concatenate([x, x1, x3], axis=0)
    out = jnp.dot(wo_ref[...], feats, preferred_element_type=f32) + bo
    o_ref[0] = out


def dense_block_forward(x_nchw, params):
    """DenseBlock forward. x_nchw: (N, Cin, H, W) f32 -> (N, Cout, H, W) f32."""
    f32 = jnp.float32
    N, Cin, H, W = x_nchw.shape
    Cout = params['w1'].shape[0]
    HW = H * W
    assert Cout % 8 == 0, "out_channel assumed a multiple of 8 (quickNAT: 64)"
    Cin_p = ((Cin + 7) // 8) * 8                  # pad in-channels to sublane mult.
    PAD = ((2 * W + 2 + 127) // 128) * 128        # halo for lane-offset tap windows

    # Channels-first, flat-spatial (lane-dense) input; zero-pad channels.
    x_flat = x_nchw.astype(f32).reshape(N, Cin, HW)
    x_flat = jnp.pad(x_flat, ((0, 0), (0, Cin_p - Cin), (0, 0)))

    # im2col weight matrices; patch-slab row order is (tap, channel).
    def conv_mat(w, cpad):                        # torch OIHW -> (O, 25*(I+cpad))
        w = jnp.pad(w.astype(f32), ((0, 0), (0, cpad), (0, 0), (0, 0)))
        o, i, kh, kw = w.shape
        return jnp.transpose(w, (0, 2, 3, 1)).reshape(o, kh * kw * i)

    w1m = conv_mat(params['w1'], Cin_p - Cin)                   # (Cout, 25*Cin_p)
    w2am = conv_mat(params['w2'][:, :Cin], Cin_p - Cin)         # (Cout, 25*Cin_p)
    w2bm = conv_mat(params['w2'][:, Cin:], 0)                   # (Cout, 25*Cout)
    wstack = jnp.concatenate([w1m, w2am], axis=0)               # (2*Cout, 25*Cin_p)

    wo = params['wo'][:, :, 0, 0].astype(f32)                   # (Cout, Cin+2*Cout)
    wo_m = jnp.concatenate(
        [jnp.pad(wo[:, :Cin], ((0, 0), (0, Cin_p - Cin))), wo[:, Cin:]], axis=1)

    # Fold conv bias + inference-mode BatchNorm into per-channel scale/shift.
    def fold_bn(bias, g, be, m, v):
        scale = g / jnp.sqrt(v + BN_EPS)
        return scale.astype(f32), (be + (bias - m) * scale).astype(f32)

    s1, t1 = fold_bn(params['b1'], params['g1'], params['be1'],
                     params['m1'], params['v1'])
    s2, t2 = fold_bn(params['b2'], params['g2'], params['be2'],
                     params['m2'], params['v2'])
    a1 = jnp.full((Cout,), params['a1'], f32)     # shared PReLU slope per channel
    a2 = jnp.full((Cout,), params['a2'], f32)
    bo = params['bo'].astype(f32)
    chan_params = jnp.stack(
        [s1, t1, a1, s2, t2, a2, bo, jnp.zeros((Cout,), f32)], axis=1)  # (Cout, 8)

    kernel = functools.partial(_dense_block_kernel, H=H, W=W, PAD=PAD)
    grid_spec = pltpu.PrefetchScalarGridSpec(
        num_scalar_prefetch=0,
        grid=(N,),
        in_specs=[
            pl.BlockSpec((1, Cin_p, HW), lambda b: (b, 0, 0)),          # x
            pl.BlockSpec(wstack.shape, lambda b: (0, 0)),               # w1 ; w2a
            pl.BlockSpec(w2bm.shape, lambda b: (0, 0)),                 # w2b
            pl.BlockSpec(wo_m.shape, lambda b: (0, 0)),                 # outconv
            pl.BlockSpec(chan_params.shape, lambda b: (0, 0)),          # BN/PReLU
        ],
        out_specs=pl.BlockSpec((1, Cout, HW), lambda b: (b, 0, 0)),
        scratch_shapes=[
            pltpu.VMEM((max(Cin_p, Cout), HW + 2 * PAD), jnp.float32)],
    )
    out_flat = pl.pallas_call(
        kernel,
        out_shape=jax.ShapeDtypeStruct((N, Cout, HW), f32),
        grid_spec=grid_spec,
        compiler_params=pltpu.CompilerParams(
            dimension_semantics=("parallel",),
            vmem_limit_bytes=32 * 1024 * 1024),
    )(x_flat, wstack, w2bm, wo_m, chan_params)

    return out_flat.reshape(N, Cout, H, W)


# ---------------------------- reference (plain JAX) --------------------------
def reference_forward(x, params):
    def conv2d(x, w, b, pad):
        y = jax.lax.conv_general_dilated(
            x, w, (1, 1), [(pad, pad), (pad, pad)],
            dimension_numbers=('NCHW', 'OIHW', 'NCHW'))
        return y + b[None, :, None, None]

    def bn(y, g, be, m, v):
        return ((y - m[None, :, None, None])
                / jnp.sqrt(v[None, :, None, None] + BN_EPS)
                * g[None, :, None, None] + be[None, :, None, None])

    def prelu(y, a):
        return jnp.maximum(y, 0.0) + a * jnp.minimum(y, 0.0)

    x1 = prelu(bn(conv2d(x, params['w1'], params['b1'], 2),
                  params['g1'], params['be1'], params['m1'], params['v1']),
               params['a1'])
    x2 = jnp.concatenate([x, x1], axis=1)
    x3 = prelu(bn(conv2d(x2, params['w2'], params['b2'], 2),
                  params['g2'], params['be2'], params['m2'], params['v2']),
               params['a2'])
    x4 = jnp.concatenate([x, x1, x3], axis=1)
    return conv2d(x4, params['wo'], params['bo'], 0)


def init_params(key, cin, cout):
    ks = jax.random.split(key, 16)
    p = {}
    p['w1'] = 0.1 * jax.random.normal(ks[0], (cout, cin, 5, 5), jnp.float32)
    p['b1'] = 0.1 * jax.random.normal(ks[1], (cout,), jnp.float32)
    p['w2'] = 0.1 * jax.random.normal(ks[2], (cout, cin + cout, 5, 5), jnp.float32)
    p['b2'] = 0.1 * jax.random.normal(ks[3], (cout,), jnp.float32)
    p['wo'] = 0.1 * jax.random.normal(ks[4], (cout, cin + 2 * cout, 1, 1), jnp.float32)
    p['bo'] = 0.1 * jax.random.normal(ks[5], (cout,), jnp.float32)
    # BatchNorm affine + running stats (inference mode)
    p['g1'] = jax.random.uniform(ks[6], (cout,), jnp.float32, 0.5, 1.5)
    p['be1'] = 0.1 * jax.random.normal(ks[7], (cout,), jnp.float32)
    p['m1'] = 0.1 * jax.random.normal(ks[8], (cout,), jnp.float32)
    p['v1'] = jax.random.uniform(ks[9], (cout,), jnp.float32, 0.5, 1.5)
    p['g2'] = jax.random.uniform(ks[10], (cout,), jnp.float32, 0.5, 1.5)
    p['be2'] = 0.1 * jax.random.normal(ks[11], (cout,), jnp.float32)
    p['m2'] = 0.1 * jax.random.normal(ks[12], (cout,), jnp.float32)
    p['v2'] = jax.random.uniform(ks[13], (cout,), jnp.float32, 0.5, 1.5)
    # PReLU (single shared slope per layer, PyTorch default init 0.25)
    p['a1'] = jnp.float32(0.25)
    p['a2'] = jnp.float32(0.25)
    return p


if __name__ == "__main__":
    N, Cin, H, W = 2, 4, 16, 16
    Cout = 8
    key = jax.random.PRNGKey(0)
    kx, kp = jax.random.split(key)
    x = jax.random.normal(kx, (N, Cin, H, W), jnp.float32)
    params = init_params(kp, Cin, Cout)

    out = jax.block_until_ready(dense_block_forward(x, params))
    assert out.shape == (N, Cout, H, W)

    ref = reference_forward(x, params)
    max_err = float(jnp.max(jnp.abs(out - ref)))
    assert max_err < 1e-3, f"max abs err {max_err}"

    print("KERNEL_OK")
</pallas_src>

<mosaic_0001>
module attributes {stable_mosaic.version = 11 : i64} {
  func.func @_dense_block_kernel(%arg0: i32, %arg1: memref<1x8x256xf32, #tpu.memory_space<vmem>>, %arg2: memref<16x200xf32, #tpu.memory_space<vmem>>, %arg3: memref<8x200xf32, #tpu.memory_space<vmem>>, %arg4: memref<8x24xf32, #tpu.memory_space<vmem>>, %arg5: memref<8x8xf32, #tpu.memory_space<vmem>>, %arg6: memref<1x8x256xf32, #tpu.memory_space<vmem>>, %arg7: memref<8x512xf32, #tpu.memory_space<vmem>>) attributes {dimension_semantics = [#tpu.dimension_semantics<parallel>], iteration_bounds = array<i64: 2>, scalar_prefetch = 0 : i64, scratch_operands = 1 : i64, tpu.core_type = #tpu.core_type<tc>, window_params = [{transform_indices = @transform_0, window_bounds = array<i64: 1, 8, 256>}, {pipeline_mode = #tpu.pipeline_mode<synchronous>, transform_indices = @transform_1, window_bounds = array<i64: 16, 200>}, {pipeline_mode = #tpu.pipeline_mode<synchronous>, transform_indices = @transform_2, window_bounds = array<i64: 8, 200>}, {pipeline_mode = #tpu.pipeline_mode<synchronous>, transform_indices = @transform_3, window_bounds = array<i64: 8, 24>}, {pipeline_mode = #tpu.pipeline_mode<synchronous>, transform_indices = @transform_4, window_bounds = array<i64: 8, 8>}, {transform_indices = @transform_5, window_bounds = array<i64: 1, 8, 256>}]} {
    %c0 = arith.constant 0 : index
    %c0_0 = arith.constant 0 : index
    %0 = vector.load %arg5[%c0, %c0_0] : memref<8x8xf32, #tpu.memory_space<vmem>>, vector<8x1xf32>
    %c0_1 = arith.constant 0 : index
    %c1 = arith.constant 1 : index
    %1 = vector.load %arg5[%c0_1, %c1] : memref<8x8xf32, #tpu.memory_space<vmem>>, vector<8x1xf32>
    %c0_2 = arith.constant 0 : index
    %c2 = arith.constant 2 : index
    %2 = vector.load %arg5[%c0_2, %c2] : memref<8x8xf32, #tpu.memory_space<vmem>>, vector<8x1xf32>
    %c0_3 = arith.constant 0 : index
    %c3 = arith.constant 3 : index
    %3 = vector.load %arg5[%c0_3, %c3] : memref<8x8xf32, #tpu.memory_space<vmem>>, vector<8x1xf32>
    %c0_4 = arith.constant 0 : index
    %c4 = arith.constant 4 : index
    %4 = vector.load %arg5[%c0_4, %c4] : memref<8x8xf32, #tpu.memory_space<vmem>>, vector<8x1xf32>
    %c0_5 = arith.constant 0 : index
    %c5 = arith.constant 5 : index
    %5 = vector.load %arg5[%c0_5, %c5] : memref<8x8xf32, #tpu.memory_space<vmem>>, vector<8x1xf32>
    %c0_6 = arith.constant 0 : index
    %c6 = arith.constant 6 : index
    %6 = vector.load %arg5[%c0_6, %c6] : memref<8x8xf32, #tpu.memory_space<vmem>>, vector<8x1xf32>
    %7 = tpu.iota {dimensions = array<i32: 1>} : vector<1x256xi32>
    %c16_i32 = arith.constant 16 : i32
    %c0_i32 = arith.constant 0 : i32
    %8 = arith.cmpi eq, %c16_i32, %c0_i32 : i32
    %c1_i32 = arith.constant 1 : i32
    %9 = arith.select %8, %c1_i32, %c16_i32 : i32
    %10 = vector.broadcast %9 : i32 to vector<1x256xi32>
    %11 = arith.remsi %7, %10 : vector<1x256xi32>
    %c0_i32_7 = arith.constant 0 : i32
    %12 = vector.broadcast %c0_i32_7 : i32 to vector<1x256xi32>
    %13 = arith.cmpi ne, %11, %12 : vector<1x256xi32>
    %c0_i32_8 = arith.constant 0 : i32
    %14 = vector.broadcast %c0_i32_8 : i32 to vector<1x256xi32>
    %15 = arith.cmpi slt, %11, %14 : vector<1x256xi32>
    %c0_i32_9 = arith.constant 0 : i32
    %16 = arith.cmpi slt, %9, %c0_i32_9 : i32
    %17 = vector.broadcast %16 : i1 to vector<1x256xi1>
    %18 = vector.broadcast %17 : vector<1x256xi1> to vector<1x256xi1>
    %19 = arith.xori %15, %18 : vector<1x256xi1>
    %20 = arith.andi %19, %13 : vector<1x256xi1>
    %21 = vector.broadcast %9 : i32 to vector<1x256xi32>
    %22 = arith.addi %11, %21 : vector<1x256xi32>
    %23 = arith.select %20, %22, %11 : vector<1x256xi1>, vector<1x256xi32>
    %c-2_i32 = arith.constant -2 : i32
    %24 = vector.broadcast %c-2_i32 : i32 to vector<1x256xi32>
    %25 = arith.addi %23, %24 : vector<1x256xi32>
    %c0_i32_10 = arith.constant 0 : i32
    %26 = vector.broadcast %c0_i32_10 : i32 to vector<1x256xi32>
    %27 = arith.cmpi sge, %25, %26 : vector<1x256xi32>
    %c-2_i32_11 = arith.constant -2 : i32
    %28 = vector.broadcast %c-2_i32_11 : i32 to vector<1x256xi32>
    %29 = arith.addi %23, %28 : vector<1x256xi32>
    %c16_i32_12 = arith.constant 16 : i32
    %30 = vector.broadcast %c16_i32_12 : i32 to vector<1x256xi32>
    %31 = arith.cmpi slt, %29, %30 : vector<1x256xi32>
    %32 = arith.andi %27, %31 : vector<1x256xi1>
    %c-1_i32 = arith.constant -1 : i32
    %33 = vector.broadcast %c-1_i32 : i32 to vector<1x256xi32>
    %34 = arith.addi %23, %33 : vector<1x256xi32>
    %c0_i32_13 = arith.constant 0 : i32
    %35 = vector.broadcast %c0_i32_13 : i32 to vector<1x256xi32>
    %36 = arith.cmpi sge, %34, %35 : vector<1x256xi32>
    %c-1_i32_14 = arith.constant -1 : i32
    %37 = vector.broadcast %c-1_i32_14 : i32 to vector<1x256xi32>
    %38 = arith.addi %23, %37 : vector<1x256xi32>
    %c16_i32_15 = arith.constant 16 : i32
    %39 = vector.broadcast %c16_i32_15 : i32 to vector<1x256xi32>
    %40 = arith.cmpi slt, %38, %39 : vector<1x256xi32>
    %41 = arith.andi %36, %40 : vector<1x256xi1>
    %c0_i32_16 = arith.constant 0 : i32
    %42 = vector.broadcast %c0_i32_16 : i32 to vector<1x256xi32>
    %43 = arith.addi %23, %42 : vector<1x256xi32>
    %c0_i32_17 = arith.constant 0 : i32
    %44 = vector.broadcast %c0_i32_17 : i32 to vector<1x256xi32>
    %45 = arith.cmpi sge, %43, %44 : vector<1x256xi32>
    %c0_i32_18 = arith.constant 0 : i32
    %46 = vector.broadcast %c0_i32_18 : i32 to vector<1x256xi32>
    %47 = arith.addi %23, %46 : vector<1x256xi32>
    %c16_i32_19 = arith.constant 16 : i32
    %48 = vector.broadcast %c16_i32_19 : i32 to vector<1x256xi32>
    %49 = arith.cmpi slt, %47, %48 : vector<1x256xi32>
    %50 = arith.andi %45, %49 : vector<1x256xi1>
    %c1_i32_20 = arith.constant 1 : i32
    %51 = vector.broadcast %c1_i32_20 : i32 to vector<1x256xi32>
    %52 = arith.addi %23, %51 : vector<1x256xi32>
    %c0_i32_21 = arith.constant 0 : i32
    %53 = vector.broadcast %c0_i32_21 : i32 to vector<1x256xi32>
    %54 = arith.cmpi sge, %52, %53 : vector<1x256xi32>
    %c1_i32_22 = arith.constant 1 : i32
    %55 = vector.broadcast %c1_i32_22 : i32 to vector<1x256xi32>
    %56 = arith.addi %23, %55 : vector<1x256xi32>
    %c16_i32_23 = arith.constant 16 : i32
    %57 = vector.broadcast %c16_i32_23 : i32 to vector<1x256xi32>
    %58 = arith.cmpi slt, %56, %57 : vector<1x256xi32>
    %59 = arith.andi %54, %58 : vector<1x256xi1>
    %c2_i32 = arith.constant 2 : i32
    %60 = vector.broadcast %c2_i32 : i32 to vector<1x256xi32>
    %61 = arith.addi %23, %60 : vector<1x256xi32>
    %c0_i32_24 = arith.constant 0 : i32
    %62 = vector.broadcast %c0_i32_24 : i32 to vector<1x256xi32>
    %63 = arith.cmpi sge, %61, %62 : vector<1x256xi32>
    %c2_i32_25 = arith.constant 2 : i32
    %64 = vector.broadcast %c2_i32_25 : i32 to vector<1x256xi32>
    %65 = arith.addi %23, %64 : vector<1x256xi32>
    %c16_i32_26 = arith.constant 16 : i32
    %66 = vector.broadcast %c16_i32_26 : i32 to vector<1x256xi32>
    %67 = arith.cmpi slt, %65, %66 : vector<1x256xi32>
    %68 = arith.andi %63, %67 : vector<1x256xi1>
    %cst = arith.constant 0.000000e+00 : f32
    %69 = vector.broadcast %cst : f32 to vector<8x128xf32>
    %c0_27 = arith.constant 0 : index
    %c0_28 = arith.constant 0 : index
    %70 = vector.load %arg7[%c0_27, %c0_28] : memref<8x512xf32, #tpu.memory_space<vmem>>, vector<8x128xf32>
    tpu.vector_store %arg7[%c0_27, %c0_28], %69 {strides = array<i32>} : memref<8x512xf32, #tpu.memory_space<vmem>>, vector<8x128xf32>,
    %cst_29 = arith.constant 0.000000e+00 : f32
    %71 = vector.broadcast %cst_29 : f32 to vector<8x128xf32>
    %c0_30 = arith.constant 0 : index
    %c384 = arith.constant 384 : index
    %72 = vector.load %arg7[%c0_30, %c384] : memref<8x512xf32, #tpu.memory_space<vmem>>, vector<8x128xf32>
    tpu.vector_store %arg7[%c0_30, %c384], %71 {strides = array<i32>} : memref<8x512xf32, #tpu.memory_space<vmem>>, vector<8x128xf32>,
    %c0_31 = arith.constant 0 : index
    %c0_32 = arith.constant 0 : index
    %c0_33 = arith.constant 0 : index
    %73 = vector.load %arg1[%c0_31, %c0_32, %c0_33] : memref<1x8x256xf32, #tpu.memory_space<vmem>>, vector<1x8x256xf32>
    %74 = vector.shape_cast %73 : vector<1x8x256xf32> to vector<8x256xf32>
    %c0_34 = arith.constant 0 : index
    %c128 = arith.constant 128 : index
    %75 = vector.load %arg7[%c0_34, %c128] : memref<8x512xf32, #tpu.memory_space<vmem>>, vector<8x256xf32>
    tpu.vector_store %arg7[%c0_34, %c128], %74 {strides = array<i32>} : memref<8x512xf32, #tpu.memory_space<vmem>>, vector<8x256xf32>,
    %c0_35 = arith.constant 0 : index
    %c94 = arith.constant 94 : index
    %76 = vector.load %arg7[%c0_35, %c94] : memref<8x512xf32, #tpu.memory_space<vmem>>, vector<8x256xf32>
    %cst_36 = arith.constant 0.000000e+00 : f32
    %77 = vector.shape_cast %32 : vector<1x256xi1> to vector<1x256xi1>
    %78 = vector.broadcast %77 : vector<1x256xi1> to vector<8x256xi1>
    %79 = vector.broadcast %cst_36 : f32 to vector<8x256xf32>
    %80 = arith.select %78, %76, %79 : vector<8x256xi1>, vector<8x256xf32>
    %c0_37 = arith.constant 0 : index
    %c95 = arith.constant 95 : index
    %81 = vector.load %arg7[%c0_37, %c95] : memref<8x512xf32, #tpu.memory_space<vmem>>, vector<8x256xf32>
    %cst_38 = arith.constant 0.000000e+00 : f32
    %82 = vector.shape_cast %41 : vector<1x256xi1> to vector<1x256xi1>
    %83 = vector.broadcast %82 : vector<1x256xi1> to vector<8x256xi1>
    %84 = vector.broadcast %cst_38 : f32 to vector<8x256xf32>
    %85 = arith.select %83, %81, %84 : vector<8x256xi1>, vector<8x256xf32>
    %c0_39 = arith.constant 0 : index
    %c96 = arith.constant 96 : index
    %86 = vector.load %arg7[%c0_39, %c96] : memref<8x512xf32, #tpu.memory_space<vmem>>, vector<8x256xf32>
    %cst_40 = arith.constant 0.000000e+00 : f32
    %87 = vector.shape_cast %50 : vector<1x256xi1> to vector<1x256xi1>
    %88 = vector.broadcast %87 : vector<1x256xi1> to vector<8x256xi1>
    %89 = vector.broadcast %cst_40 : f32 to vector<8x256xf32>
    %90 = arith.select %88, %86, %89 : vector<8x256xi1>, vector<8x256xf32>
    %c0_41 = arith.constant 0 : index
    %c97 = arith.constant 97 : index
    %91 = vector.load %arg7[%c0_41, %c97] : memref<8x512xf32, #tpu.memory_space<vmem>>, vector<8x256xf32>
    %cst_42 = arith.constant 0.000000e+00 : f32
    %92 = vector.shape_cast %59 : vector<1x256xi1> to vector<1x256xi1>
    %93 = vector.broadcast %92 : vector<1x256xi1> to vector<8x256xi1>
    %94 = vector.broadcast %cst_42 : f32 to vector<8x256xf32>
    %95 = arith.select %93, %91, %94 : vector<8x256xi1>, vector<8x256xf32>
    %c0_43 = arith.constant 0 : index
    %c98 = arith.constant 98 : index
    %96 = vector.load %arg7[%c0_43, %c98] : memref<8x512xf32, #tpu.memory_space<vmem>>, vector<8x256xf32>
    %cst_44 = arith.constant 0.000000e+00 : f32
    %97 = vector.shape_cast %68 : vector<1x256xi1> to vector<1x256xi1>
    %98 = vector.broadcast %97 : vector<1x256xi1> to vector<8x256xi1>
    %99 = vector.broadcast %cst_44 : f32 to vector<8x256xf32>
    %100 = arith.select %98, %96, %99 : vector<8x256xi1>, vector<8x256xf32>
    %c0_45 = arith.constant 0 : index
    %c110 = arith.constant 110 : index
    %101 = vector.load %arg7[%c0_45, %c110] : memref<8x512xf32, #tpu.memory_space<vmem>>, vector<8x256xf32>
    %cst_46 = arith.constant 0.000000e+00 : f32
    %102 = vector.shape_cast %32 : vector<1x256xi1> to vector<1x256xi1>
    %103 = vector.broadcast %102 : vector<1x256xi1> to vector<8x256xi1>
    %104 = vector.broadcast %cst_46 : f32 to vector<8x256xf32>
    %105 = arith.select %103, %101, %104 : vector<8x256xi1>, vector<8x256xf32>
    %c0_47 = arith.constant 0 : index
    %c111 = arith.constant 111 : index
    %106 = vector.load %arg7[%c0_47, %c111] : memref<8x512xf32, #tpu.memory_space<vmem>>, vector<8x256xf32>
    %cst_48 = arith.constant 0.000000e+00 : f32
    %107 = vector.shape_cast %41 : vector<1x256xi1> to vector<1x256xi1>
    %108 = vector.broadcast %107 : vector<1x256xi1> to vector<8x256xi1>
    %109 = vector.broadcast %cst_48 : f32 to vector<8x256xf32>
    %110 = arith.select %108, %106, %109 : vector<8x256xi1>, vector<8x256xf32>
    %c0_49 = arith.constant 0 : index
    %c112 = arith.constant 112 : index
    %111 = vector.load %arg7[%c0_49, %c112] : memref<8x512xf32, #tpu.memory_space<vmem>>, vector<8x256xf32>
    %cst_50 = arith.constant 0.000000e+00 : f32
    %112 = vector.shape_cast %50 : vector<1x256xi1> to vector<1x256xi1>
    %113 = vector.broadcast %112 : vector<1x256xi1> to vector<8x256xi1>
    %114 = vector.broadcast %cst_50 : f32 to vector<8x256xf32>
    %115 = arith.select %113, %111, %114 : vector<8x256xi1>, vector<8x256xf32>
    %c0_51 = arith.constant 0 : index
    %c113 = arith.constant 113 : index
    %116 = vector.load %arg7[%c0_51, %c113] : memref<8x512xf32, #tpu.memory_space<vmem>>, vector<8x256xf32>
    %cst_52 = arith.constant 0.000000e+00 : f32
    %117 = vector.shape_cast %59 : vector<1x256xi1> to vector<1x256xi1>
    %118 = vector.broadcast %117 : vector<1x256xi1> to vector<8x256xi1>
    %119 = vector.broadcast %cst_52 : f32 to vector<8x256xf32>
    %120 = arith.select %118, %116, %119 : vector<8x256xi1>, vector<8x256xf32>
    %c0_53 = arith.constant 0 : index
    %c114 = arith.constant 114 : index
    %121 = vector.load %arg7[%c0_53, %c114] : memref<8x512xf32, #tpu.memory_space<vmem>>, vector<8x256xf32>
    %cst_54 = arith.constant 0.000000e+00 : f32
    %122 = vector.shape_cast %68 : vector<1x256xi1> to vector<1x256xi1>
    %123 = vector.broadcast %122 : vector<1x256xi1> to vector<8x256xi1>
    %124 = vector.broadcast %cst_54 : f32 to vector<8x256xf32>
    %125 = arith.select %123, %121, %124 : vector<8x256xi1>, vector<8x256xf32>
    %c0_55 = arith.constant 0 : index
    %c126 = arith.constant 126 : index
    %126 = vector.load %arg7[%c0_55, %c126] : memref<8x512xf32, #tpu.memory_space<vmem>>, vector<8x256xf32>
    %cst_56 = arith.constant 0.000000e+00 : f32
    %127 = vector.shape_cast %32 : vector<1x256xi1> to vector<1x256xi1>
    %128 = vector.broadcast %127 : vector<1x256xi1> to vector<8x256xi1>
    %129 = vector.broadcast %cst_56 : f32 to vector<8x256xf32>
    %130 = arith.select %128, %126, %129 : vector<8x256xi1>, vector<8x256xf32>
    %c0_57 = arith.constant 0 : index
    %c127 = arith.constant 127 : index
    %131 = vector.load %arg7[%c0_57, %c127] : memref<8x512xf32, #tpu.memory_space<vmem>>, vector<8x256xf32>
    %cst_58 = arith.constant 0.000000e+00 : f32
    %132 = vector.shape_cast %41 : vector<1x256xi1> to vector<1x256xi1>
    %133 = vector.broadcast %132 : vector<1x256xi1> to vector<8x256xi1>
    %134 = vector.broadcast %cst_58 : f32 to vector<8x256xf32>
    %135 = arith.select %133, %131, %134 : vector<8x256xi1>, vector<8x256xf32>
    %c0_59 = arith.constant 0 : index
    %c128_60 = arith.constant 128 : index
    %136 = vector.load %arg7[%c0_59, %c128_60] : memref<8x512xf32, #tpu.memory_space<vmem>>, vector<8x256xf32>
    %cst_61 = arith.constant 0.000000e+00 : f32
    %137 = vector.shape_cast %50 : vector<1x256xi1> to vector<1x256xi1>
    %138 = vector.broadcast %137 : vector<1x256xi1> to vector<8x256xi1>
    %139 = vector.broadcast %cst_61 : f32 to vector<8x256xf32>
    %140 = arith.select %138, %136, %139 : vector<8x256xi1>, vector<8x256xf32>
    %c0_62 = arith.constant 0 : index
    %c129 = arith.constant 129 : index
    %141 = vector.load %arg7[%c0_62, %c129] : memref<8x512xf32, #tpu.memory_space<vmem>>, vector<8x256xf32>
    %cst_63 = arith.constant 0.000000e+00 : f32
    %142 = vector.shape_cast %59 : vector<1x256xi1> to vector<1x256xi1>
    %143 = vector.broadcast %142 : vector<1x256xi1> to vector<8x256xi1>
    %144 = vector.broadcast %cst_63 : f32 to vector<8x256xf32>
    %145 = arith.select %143, %141, %144 : vector<8x256xi1>, vector<8x256xf32>
    %c0_64 = arith.constant 0 : index
    %c130 = arith.constant 130 : index
    %146 = vector.load %arg7[%c0_64, %c130] : memref<8x512xf32, #tpu.memory_space<vmem>>, vector<8x256xf32>
    %cst_65 = arith.constant 0.000000e+00 : f32
    %147 = vector.shape_cast %68 : vector<1x256xi1> to vector<1x256xi1>
    %148 = vector.broadcast %147 : vector<1x256xi1> to vector<8x256xi1>
    %149 = vector.broadcast %cst_65 : f32 to vector<8x256xf32>
    %150 = arith.select %148, %146, %149 : vector<8x256xi1>, vector<8x256xf32>
    %c0_66 = arith.constant 0 : index
    %c142 = arith.constant 142 : index
    %151 = vector.load %arg7[%c0_66, %c142] : memref<8x512xf32, #tpu.memory_space<vmem>>, vector<8x256xf32>
    %cst_67 = arith.constant 0.000000e+00 : f32
    %152 = vector.shape_cast %32 : vector<1x256xi1> to vector<1x256xi1>
    %153 = vector.broadcast %152 : vector<1x256xi1> to vector<8x256xi1>
    %154 = vector.broadcast %cst_67 : f32 to vector<8x256xf32>
    %155 = arith.select %153, %151, %154 : vector<8x256xi1>, vector<8x256xf32>
    %c0_68 = arith.constant 0 : index
    %c143 = arith.constant 143 : index
    %156 = vector.load %arg7[%c0_68, %c143] : memref<8x512xf32, #tpu.memory_space<vmem>>, vector<8x256xf32>
    %cst_69 = arith.constant 0.000000e+00 : f32
    %157 = vector.shape_cast %41 : vector<1x256xi1> to vector<1x256xi1>
    %158 = vector.broadcast %157 : vector<1x256xi1> to vector<8x256xi1>
    %159 = vector.broadcast %cst_69 : f32 to vector<8x256xf32>
    %160 = arith.select %158, %156, %159 : vector<8x256xi1>, vector<8x256xf32>
    %c0_70 = arith.constant 0 : index
    %c144 = arith.constant 144 : index
    %161 = vector.load %arg7[%c0_70, %c144] : memref<8x512xf32, #tpu.memory_space<vmem>>, vector<8x256xf32>
    %cst_71 = arith.constant 0.000000e+00 : f32
    %162 = vector.shape_cast %50 : vector<1x256xi1> to vector<1x256xi1>
    %163 = vector.broadcast %162 : vector<1x256xi1> to vector<8x256xi1>
    %164 = vector.broadcast %cst_71 : f32 to vector<8x256xf32>
    %165 = arith.select %163, %161, %164 : vector<8x256xi1>, vector<8x256xf32>
    %c0_72 = arith.constant 0 : index
    %c145 = arith.constant 145 : index
    %166 = vector.load %arg7[%c0_72, %c145] : memref<8x512xf32, #tpu.memory_space<vmem>>, vector<8x256xf32>
    %cst_73 = arith.constant 0.000000e+00 : f32
    %167 = vector.shape_cast %59 : vector<1x256xi1> to vector<1x256xi1>
    %168 = vector.broadcast %167 : vector<1x256xi1> to vector<8x256xi1>
    %169 = vector.broadcast %cst_73 : f32 to vector<8x256xf32>
    %170 = arith.select %168, %166, %169 : vector<8x256xi1>, vector<8x256xf32>
    %c0_74 = arith.constant 0 : index
    %c146 = arith.constant 146 : index
    %171 = vector.load %arg7[%c0_74, %c146] : memref<8x512xf32, #tpu.memory_space<vmem>>, vector<8x256xf32>
    %cst_75 = arith.constant 0.000000e+00 : f32
    %172 = vector.shape_cast %68 : vector<1x256xi1> to vector<1x256xi1>
    %173 = vector.broadcast %172 : vector<1x256xi1> to vector<8x256xi1>
    %174 = vector.broadcast %cst_75 : f32 to vector<8x256xf32>
    %175 = arith.select %173, %171, %174 : vector<8x256xi1>, vector<8x256xf32>
    %c0_76 = arith.constant 0 : index
    %c158 = arith.constant 158 : index
    %176 = vector.load %arg7[%c0_76, %c158] : memref<8x512xf32, #tpu.memory_space<vmem>>, vector<8x256xf32>
    %cst_77 = arith.constant 0.000000e+00 : f32
    %177 = vector.shape_cast %32 : vector<1x256xi1> to vector<1x256xi1>
    %178 = vector.broadcast %177 : vector<1x256xi1> to vector<8x256xi1>
    %179 = vector.broadcast %cst_77 : f32 to vector<8x256xf32>
    %180 = arith.select %178, %176, %179 : vector<8x256xi1>, vector<8x256xf32>
    %c0_78 = arith.constant 0 : index
    %c159 = arith.constant 159 : index
    %181 = vector.load %arg7[%c0_78, %c159] : memref<8x512xf32, #tpu.memory_space<vmem>>, vector<8x256xf32>
    %cst_79 = arith.constant 0.000000e+00 : f32
    %182 = vector.shape_cast %41 : vector<1x256xi1> to vector<1x256xi1>
    %183 = vector.broadcast %182 : vector<1x256xi1> to vector<8x256xi1>
    %184 = vector.broadcast %cst_79 : f32 to vector<8x256xf32>
    %185 = arith.select %183, %181, %184 : vector<8x256xi1>, vector<8x256xf32>
    %c0_80 = arith.constant 0 : index
    %c160 = arith.constant 160 : index
    %186 = vector.load %arg7[%c0_80, %c160] : memref<8x512xf32, #tpu.memory_space<vmem>>, vector<8x256xf32>
    %cst_81 = arith.constant 0.000000e+00 : f32
    %187 = vector.shape_cast %50 : vector<1x256xi1> to vector<1x256xi1>
    %188 = vector.broadcast %187 : vector<1x256xi1> to vector<8x256xi1>
    %189 = vector.broadcast %cst_81 : f32 to vector<8x256xf32>
    %190 = arith.select %188, %186, %189 : vector<8x256xi1>, vector<8x256xf32>
    %c0_82 = arith.constant 0 : index
    %c161 = arith.constant 161 : index
    %191 = vector.load %arg7[%c0_82, %c161] : memref<8x512xf32, #tpu.memory_space<vmem>>, vector<8x256xf32>
    %cst_83 = arith.constant 0.000000e+00 : f32
    %192 = vector.shape_cast %59 : vector<1x256xi1> to vector<1x256xi1>
    %193 = vector.broadcast %192 : vector<1x256xi1> to vector<8x256xi1>
    %194 = vector.broadcast %cst_83 : f32 to vector<8x256xf32>
    %195 = arith.select %193, %191, %194 : vector<8x256xi1>, vector<8x256xf32>
    %c0_84 = arith.constant 0 : index
    %c162 = arith.constant 162 : index
    %196 = vector.load %arg7[%c0_84, %c162] : memref<8x512xf32, #tpu.memory_space<vmem>>, vector<8x256xf32>
    %cst_85 = arith.constant 0.000000e+00 : f32
    %197 = vector.shape_cast %68 : vector<1x256xi1> to vector<1x256xi1>
    %198 = vector.broadcast %197 : vector<1x256xi1> to vector<8x256xi1>
    %199 = vector.broadcast %cst_85 : f32 to vector<8x256xf32>
    %200 = arith.select %198, %196, %199 : vector<8x256xi1>, vector<8x256xf32>
    %201 = tpu.concatenate %80, %85, %90, %95, %100, %105, %110, %115, %120, %125, %130, %135, %140, %145, %150, %155 in 0 : vector<8x256xf32>, vector<8x256xf32>, vector<8x256xf32>, vector<8x256xf32>, vector<8x256xf32>, vector<8x256xf32>, vector<8x256xf32>, vector<8x256xf32>, vector<8x256xf32>, vector<8x256xf32>, vector<8x256xf32>, vector<8x256xf32>, vector<8x256xf32>, vector<8x256xf32>, vector<8x256xf32>, vector<8x256xf32> -> vector<128x256xf32>
    %202 = tpu.concatenate %160, %165, %170, %175, %180, %185, %190, %195, %200 in 0 : vector<8x256xf32>, vector<8x256xf32>, vector<8x256xf32>, vector<8x256xf32>, vector<8x256xf32>, vector<8x256xf32>, vector<8x256xf32>, vector<8x256xf32>, vector<8x256xf32> -> vector<72x256xf32>
    %203 = tpu.concatenate %201, %202 in 0 : vector<128x256xf32>, vector<72x256xf32> -> vector<200x256xf32>
    %c0_86 = arith.constant 0 : index
    %c0_87 = arith.constant 0 : index
    %204 = vector.load %arg2[%c0_86, %c0_87] : memref<16x200xf32, #tpu.memory_space<vmem>>, vector<16x200xf32>
    %cst_88 = arith.constant dense<0.000000e+00> : vector<16x256xf32>
    %205 = tpu.matmul %204, %203, %cst_88 {dimension_numbers = #tpu.dot_dimension_numbers<[1], [0], [0], [1], [0, 0, 1, 1], [], []>} : vector<16x200xf32>, vector<200x256xf32>, vector<16x256xf32> -> vector<16x256xf32>
    %206 = vector.extract_strided_slice %205 {offsets = [0, 0], sizes = [8, 256], strides = [1, 1]} : vector<16x256xf32> to vector<8x256xf32>
    %207 = vector.broadcast %0 : vector<8x1xf32> to vector<8x256xf32>
    %208 = arith.mulf %206, %207 : vector<8x256xf32>
    %209 = vector.broadcast %1 : vector<8x1xf32> to vector<8x256xf32>
    %210 = arith.addf %208, %209 : vector<8x256xf32>
    %cst_89 = arith.constant 0.000000e+00 : f32
    %211 = vector.broadcast %cst_89 : f32 to vector<8x256xf32>
    %212 = arith.maximumf %210, %211 : vector<8x256xf32>
    %cst_90 = arith.constant 0.000000e+00 : f32
    %213 = vector.broadcast %cst_90 : f32 to vector<8x256xf32>
    %214 = arith.minimumf %210, %213 : vector<8x256xf32>
    %215 = vector.broadcast %2 : vector<8x1xf32> to vector<8x256xf32>
    %216 = arith.mulf %215, %214 : vector<8x256xf32>
    %217 = arith.addf %212, %216 : vector<8x256xf32>
    %c0_91 = arith.constant 0 : index
    %c128_92 = arith.constant 128 : index
    %218 = vector.load %arg7[%c0_91, %c128_92] : memref<8x512xf32, #tpu.memory_space<vmem>>, vector<8x256xf32>
    tpu.vector_store %arg7[%c0_91, %c128_92], %217 {strides = array<i32>} : memref<8x512xf32, #tpu.memory_space<vmem>>, vector<8x256xf32>,
    %c0_93 = arith.constant 0 : index
    %c94_94 = arith.constant 94 : index
    %219 = vector.load %arg7[%c0_93, %c94_94] : memref<8x512xf32, #tpu.memory_space<vmem>>, vector<8x256xf32>
    %cst_95 = arith.constant 0.000000e+00 : f32
    %220 = vector.shape_cast %32 : vector<1x256xi1> to vector<1x256xi1>
    %221 = vector.broadcast %220 : vector<1x256xi1> to vector<8x256xi1>
    %222 = vector.broadcast %cst_95 : f32 to vector<8x256xf32>
    %223 = arith.select %221, %219, %222 : vector<8x256xi1>, vector<8x256xf32>
    %c0_96 = arith.constant 0 : index
    %c95_97 = arith.constant 95 : index
    %224 = vector.load %arg7[%c0_96, %c95_97] : memref<8x512xf32, #tpu.memory_space<vmem>>, vector<8x256xf32>
    %cst_98 = arith.constant 0.000000e+00 : f32
    %225 = vector.shape_cast %41 : vector<1x256xi1> to vector<1x256xi1>
    %226 = vector.broadcast %225 : vector<1x256xi1> to vector<8x256xi1>
    %227 = vector.broadcast %cst_98 : f32 to vector<8x256xf32>
    %228 = arith.select %226, %224, %227 : vector<8x256xi1>, vector<8x256xf32>
    %c0_99 = arith.constant 0 : index
    %c96_100 = arith.constant 96 : index
    %229 = vector.load %arg7[%c0_99, %c96_100] : memref<8x512xf32, #tpu.memory_space<vmem>>, vector<8x256xf32>
    %cst_101 = arith.constant 0.000000e+00 : f32
    %230 = vector.shape_cast %50 : vector<1x256xi1> to vector<1x256xi1>
    %231 = vector.broadcast %230 : vector<1x256xi1> to vector<8x256xi1>
    %232 = vector.broadcast %cst_101 : f32 to vector<8x256xf32>
    %233 = arith.select %231, %229, %232 : vector<8x256xi1>, vector<8x256xf32>
    %c0_102 = arith.constant 0 : index
    %c97_103 = arith.constant 97 : index
    %234 = vector.load %arg7[%c0_102, %c97_103] : memref<8x512xf32, #tpu.memory_space<vmem>>, vector<8x256xf32>
    %cst_104 = arith.constant 0.000000e+00 : f32
    %235 = vector.shape_cast %59 : vector<1x256xi1> to vector<1x256xi1>
    %236 = vector.broadcast %235 : vector<1x256xi1> to vector<8x256xi1>
    %237 = vector.broadcast %cst_104 : f32 to vector<8x256xf32>
    %238 = arith.select %236, %234, %237 : vector<8x256xi1>, vector<8x256xf32>
    %c0_105 = arith.constant 0 : index
    %c98_106 = arith.constant 98 : index
    %239 = vector.load %arg7[%c0_105, %c98_106] : memref<8x512xf32, #tpu.memory_space<vmem>>, vector<8x256xf32>
    %cst_107 = arith.constant 0.000000e+00 : f32
    %240 = vector.shape_cast %68 : vector<1x256xi1> to vector<1x256xi1>
    %241 = vector.broadcast %240 : vector<1x256xi1> to vector<8x256xi1>
    %242 = vector.broadcast %cst_107 : f32 to vector<8x256xf32>
    %243 = arith.select %241, %239, %242 : vector<8x256xi1>, vector<8x256xf32>
    %c0_108 = arith.constant 0 : index
    %c110_109 = arith.constant 110 : index
    %244 = vector.load %arg7[%c0_108, %c110_109] : memref<8x512xf32, #tpu.memory_space<vmem>>, vector<8x256xf32>
    %cst_110 = arith.constant 0.000000e+00 : f32
    %245 = vector.shape_cast %32 : vector<1x256xi1> to vector<1x256xi1>
    %246 = vector.broadcast %245 : vector<1x256xi1> to vector<8x256xi1>
    %247 = vector.broadcast %cst_110 : f32 to vector<8x256xf32>
    %248 = arith.select %246, %244, %247 : vector<8x256xi1>, vector<8x256xf32>
    %c0_111 = arith.constant 0 : index
    %c111_112 = arith.constant 111 : index
    %249 = vector.load %arg7[%c0_111, %c111_112] : memref<8x512xf32, #tpu.memory_space<vmem>>, vector<8x256xf32>
    %cst_113 = arith.constant 0.000000e+00 : f32
    %250 = vector.shape_cast %41 : vector<1x256xi1> to vector<1x256xi1>
    %251 = vector.broadcast %250 : vector<1x256xi1> to vector<8x256xi1>
    %252 = vector.broadcast %cst_113 : f32 to vector<8x256xf32>
    %253 = arith.select %251, %249, %252 : vector<8x256xi1>, vector<8x256xf32>
    %c0_114 = arith.constant 0 : index
    %c112_115 = arith.constant 112 : index
    %254 = vector.load %arg7[%c0_114, %c112_115] : memref<8x512xf32, #tpu.memory_space<vmem>>, vector<8x256xf32>
    %cst_116 = arith.constant 0.000000e+00 : f32
    %255 = vector.shape_cast %50 : vector<1x256xi1> to vector<1x256xi1>
    %256 = vector.broadcast %255 : vector<1x256xi1> to vector<8x256xi1>
    %257 = vector.broadcast %cst_116 : f32 to vector<8x256xf32>
    %258 = arith.select %256, %254, %257 : vector<8x256xi1>, vector<8x256xf32>
    %c0_117 = arith.constant 0 : index
    %c113_118 = arith.constant 113 : index
    %259 = vector.load %arg7[%c0_117, %c113_118] : memref<8x512xf32, #tpu.memory_space<vmem>>, vector<8x256xf32>
    %cst_119 = arith.constant 0.000000e+00 : f32
    %260 = vector.shape_cast %59 : vector<1x256xi1> to vector<1x256xi1>
    %261 = vector.broadcast %260 : vector<1x256xi1> to vector<8x256xi1>
    %262 = vector.broadcast %cst_119 : f32 to vector<8x256xf32>
    %263 = arith.select %261, %259, %262 : vector<8x256xi1>, vector<8x256xf32>
    %c0_120 = arith.constant 0 : index
    %c114_121 = arith.constant 114 : index
    %264 = vector.load %arg7[%c0_120, %c114_121] : memref<8x512xf32, #tpu.memory_space<vmem>>, vector<8x256xf32>
    %cst_122 = arith.constant 0.000000e+00 : f32
    %265 = vector.shape_cast %68 : vector<1x256xi1> to vector<1x256xi1>
    %266 = vector.broadcast %265 : vector<1x256xi1> to vector<8x256xi1>
    %267 = vector.broadcast %cst_122 : f32 to vector<8x256xf32>
    %268 = arith.select %266, %264, %267 : vector<8x256xi1>, vector<8x256xf32>
    %c0_123 = arith.constant 0 : index
    %c126_124 = arith.constant 126 : index
    %269 = vector.load %arg7[%c0_123, %c126_124] : memref<8x512xf32, #tpu.memory_space<vmem>>, vector<8x256xf32>
    %cst_125 = arith.constant 0.000000e+00 : f32
    %270 = vector.shape_cast %32 : vector<1x256xi1> to vector<1x256xi1>
    %271 = vector.broadcast %270 : vector<1x256xi1> to vector<8x256xi1>
    %272 = vector.broadcast %cst_125 : f32 to vector<8x256xf32>
    %273 = arith.select %271, %269, %272 : vector<8x256xi1>, vector<8x256xf32>
    %c0_126 = arith.constant 0 : index
    %c127_127 = arith.constant 127 : index
    %274 = vector.load %arg7[%c0_126, %c127_127] : memref<8x512xf32, #tpu.memory_space<vmem>>, vector<8x256xf32>
    %cst_128 = arith.constant 0.000000e+00 : f32
    %275 = vector.shape_cast %41 : vector<1x256xi1> to vector<1x256xi1>
    %276 = vector.broadcast %275 : vector<1x256xi1> to vector<8x256xi1>
    %277 = vector.broadcast %cst_128 : f32 to vector<8x256xf32>
    %278 = arith.select %276, %274, %277 : vector<8x256xi1>, vector<8x256xf32>
    %c0_129 = arith.constant 0 : index
    %c128_130 = arith.constant 128 : index
    %279 = vector.load %arg7[%c0_129, %c128_130] : memref<8x512xf32, #tpu.memory_space<vmem>>, vector<8x256xf32>
    %cst_131 = arith.constant 0.000000e+00 : f32
    %280 = vector.shape_cast %50 : vector<1x256xi1> to vector<1x256xi1>
    %281 = vector.broadcast %280 : vector<1x256xi1> to vector<8x256xi1>
    %282 = vector.broadcast %cst_131 : f32 to vector<8x256xf32>
    %283 = arith.select %281, %279, %282 : vector<8x256xi1>, vector<8x256xf32>
    %c0_132 = arith.constant 0 : index
    %c129_133 = arith.constant 129 : index
    %284 = vector.load %arg7[%c0_132, %c129_133] : memref<8x512xf32, #tpu.memory_space<vmem>>, vector<8x256xf32>
    %cst_134 = arith.constant 0.000000e+00 : f32
    %285 = vector.shape_cast %59 : vector<1x256xi1> to vector<1x256xi1>
    %286 = vector.broadcast %285 : vector<1x256xi1> to vector<8x256xi1>
    %287 = vector.broadcast %cst_134 : f32 to vector<8x256xf32>
    %288 = arith.select %286, %284, %287 : vector<8x256xi1>, vector<8x256xf32>
    %c0_135 = arith.constant 0 : index
    %c130_136 = arith.constant 130 : index
    %289 = vector.load %arg7[%c0_135, %c130_136] : memref<8x512xf32, #tpu.memory_space<vmem>>, vector<8x256xf32>
    %cst_137 = arith.constant 0.000000e+00 : f32
    %290 = vector.shape_cast %68 : vector<1x256xi1> to vector<1x256xi1>
    %291 = vector.broadcast %290 : vector<1x256xi1> to vector<8x256xi1>
    %292 = vector.broadcast %cst_137 : f32 to vector<8x256xf32>
    %293 = arith.select %291, %289, %292 : vector<8x256xi1>, vector<8x256xf32>
    %c0_138 = arith.constant 0 : index
    %c142_139 = arith.constant 142 : index
    %294 = vector.load %arg7[%c0_138, %c142_139] : memref<8x512xf32, #tpu.memory_space<vmem>>, vector<8x256xf32>
    %cst_140 = arith.constant 0.000000e+00 : f32
    %295 = vector.shape_cast %32 : vector<1x256xi1> to vector<1x256xi1>
    %296 = vector.broadcast %295 : vector<1x256xi1> to vector<8x256xi1>
    %297 = vector.broadcast %cst_140 : f32 to vector<8x256xf32>
    %298 = arith.select %296, %294, %297 : vector<8x256xi1>, vector<8x256xf32>
    %c0_141 = arith.constant 0 : index
    %c143_142 = arith.constant 143 : index
    %299 = vector.load %arg7[%c0_141, %c143_142] : memref<8x512xf32, #tpu.memory_space<vmem>>, vector<8x256xf32>
    %cst_143 = arith.constant 0.000000e+00 : f32
    %300 = vector.shape_cast %41 : vector<1x256xi1> to vector<1x256xi1>
    %301 = vector.broadcast %300 : vector<1x256xi1> to vector<8x256xi1>
    %302 = vector.broadcast %cst_143 : f32 to vector<8x256xf32>
    %303 = arith.select %301, %299, %302 : vector<8x256xi1>, vector<8x256xf32>
    %c0_144 = arith.constant 0 : index
    %c144_145 = arith.constant 144 : index
    %304 = vector.load %arg7[%c0_144, %c144_145] : memref<8x512xf32, #tpu.memory_space<vmem>>, vector<8x256xf32>
    %cst_146 = arith.constant 0.000000e+00 : f32
    %305 = vector.shape_cast %50 : vector<1x256xi1> to vector<1x256xi1>
    %306 = vector.broadcast %305 : vector<1x256xi1> to vector<8x256xi1>
    %307 = vector.broadcast %cst_146 : f32 to vector<8x256xf32>
    %308 = arith.select %306, %304, %307 : vector<8x256xi1>, vector<8x256xf32>
    %c0_147 = arith.constant 0 : index
    %c145_148 = arith.constant 145 : index
    %309 = vector.load %arg7[%c0_147, %c145_148] : memref<8x512xf32, #tpu.memory_space<vmem>>, vector<8x256xf32>
    %cst_149 = arith.constant 0.000000e+00 : f32
    %310 = vector.shape_cast %59 : vector<1x256xi1> to vector<1x256xi1>
    %311 = vector.broadcast %310 : vector<1x256xi1> to vector<8x256xi1>
    %312 = vector.broadcast %cst_149 : f32 to vector<8x256xf32>
    %313 = arith.select %311, %309, %312 : vector<8x256xi1>, vector<8x256xf32>
    %c0_150 = arith.constant 0 : index
    %c146_151 = arith.constant 146 : index
    %314 = vector.load %arg7[%c0_150, %c146_151] : memref<8x512xf32, #tpu.memory_space<vmem>>, vector<8x256xf32>
    %cst_152 = arith.constant 0.000000e+00 : f32
    %315 = vector.shape_cast %68 : vector<1x256xi1> to vector<1x256xi1>
    %316 = vector.broadcast %315 : vector<1x256xi1> to vector<8x256xi1>
    %317 = vector.broadcast %cst_152 : f32 to vector<8x256xf32>
    %318 = arith.select %316, %314, %317 : vector<8x256xi1>, vector<8x256xf32>
    %c0_153 = arith.constant 0 : index
    %c158_154 = arith.constant 158 : index
    %319 = vector.load %arg7[%c0_153, %c158_154] : memref<8x512xf32, #tpu.memory_space<vmem>>, vector<8x256xf32>
    %cst_155 = arith.constant 0.000000e+00 : f32
    %320 = vector.shape_cast %32 : vector<1x256xi1> to vector<1x256xi1>
    %321 = vector.broadcast %320 : vector<1x256xi1> to vector<8x256xi1>
    %322 = vector.broadcast %cst_155 : f32 to vector<8x256xf32>
    %323 = arith.select %321, %319, %322 : vector<8x256xi1>, vector<8x256xf32>
    %c0_156 = arith.constant 0 : index
    %c159_157 = arith.constant 159 : index
    %324 = vector.load %arg7[%c0_156, %c159_157] : memref<8x512xf32, #tpu.memory_space<vmem>>, vector<8x256xf32>
    %cst_158 = arith.constant 0.000000e+00 : f32
    %325 = vector.shape_cast %41 : vector<1x256xi1> to vector<1x256xi1>
    %326 = vector.broadcast %325 : vector<1x256xi1> to vector<8x256xi1>
    %327 = vector.broadcast %cst_158 : f32 to vector<8x256xf32>
    %328 = arith.select %326, %324, %327 : vector<8x256xi1>, vector<8x256xf32>
    %c0_159 = arith.constant 0 : index
    %c160_160 = arith.constant 160 : index
    %329 = vector.load %arg7[%c0_159, %c160_160] : memref<8x512xf32, #tpu.memory_space<vmem>>, vector<8x256xf32>
    %cst_161 = arith.constant 0.000000e+00 : f32
    %330 = vector.shape_cast %50 : vector<1x256xi1> to vector<1x256xi1>
    %331 = vector.broadcast %330 : vector<1x256xi1> to vector<8x256xi1>
    %332 = vector.broadcast %cst_161 : f32 to vector<8x256xf32>
    %333 = arith.select %331, %329, %332 : vector<8x256xi1>, vector<8x256xf32>
    %c0_162 = arith.constant 0 : index
    %c161_163 = arith.constant 161 : index
    %334 = vector.load %arg7[%c0_162, %c161_163] : memref<8x512xf32, #tpu.memory_space<vmem>>, vector<8x256xf32>
    %cst_164 = arith.constant 0.000000e+00 : f32
    %335 = vector.shape_cast %59 : vector<1x256xi1> to vector<1x256xi1>
    %336 = vector.broadcast %335 : vector<1x256xi1> to vector<8x256xi1>
    %337 = vector.broadcast %cst_164 : f32 to vector<8x256xf32>
    %338 = arith.select %336, %334, %337 : vector<8x256xi1>, vector<8x256xf32>
    %c0_165 = arith.constant 0 : index
    %c162_166 = arith.constant 162 : index
    %339 = vector.load %arg7[%c0_165, %c162_166] : memref<8x512xf32, #tpu.memory_space<vmem>>, vector<8x256xf32>
    %cst_167 = arith.constant 0.000000e+00 : f32
    %340 = vector.shape_cast %68 : vector<1x256xi1> to vector<1x256xi1>
    %341 = vector.broadcast %340 : vector<1x256xi1> to vector<8x256xi1>
    %342 = vector.broadcast %cst_167 : f32 to vector<8x256xf32>
    %343 = arith.select %341, %339, %342 : vector<8x256xi1>, vector<8x256xf32>
    %344 = tpu.concatenate %223, %228, %233, %238, %243, %248, %253, %258, %263, %268, %273, %278, %283, %288, %293, %298 in 0 : vector<8x256xf32>, vector<8x256xf32>, vector<8x256xf32>, vector<8x256xf32>, vector<8x256xf32>, vector<8x256xf32>, vector<8x256xf32>, vector<8x256xf32>, vector<8x256xf32>, vector<8x256xf32>, vector<8x256xf32>, vector<8x256xf32>, vector<8x256xf32>, vector<8x256xf32>, vector<8x256xf32>, vector<8x256xf32> -> vector<128x256xf32>
    %345 = tpu.concatenate %303, %308, %313, %318, %323, %328, %333, %338, %343 in 0 : vector<8x256xf32>, vector<8x256xf32>, vector<8x256xf32>, vector<8x256xf32>, vector<8x256xf32>, vector<8x256xf32>, vector<8x256xf32>, vector<8x256xf32>, vector<8x256xf32> -> vector<72x256xf32>
    %346 = tpu.concatenate %344, %345 in 0 : vector<128x256xf32>, vector<72x256xf32> -> vector<200x256xf32>
    %347 = vector.extract_strided_slice %205 {offsets = [8, 0], sizes = [8, 256], strides = [1, 1]} : vector<16x256xf32> to vector<8x256xf32>
    %c0_168 = arith.constant 0 : index
    %c0_169 = arith.constant 0 : index
    %348 = vector.load %arg3[%c0_168, %c0_169] : memref<8x200xf32, #tpu.memory_space<vmem>>, vector<8x200xf32>
    %cst_170 = arith.constant dense<0.000000e+00> : vector<8x256xf32>
    %349 = tpu.matmul %348, %346, %cst_170 {dimension_numbers = #tpu.dot_dimension_numbers<[1], [0], [0], [1], [0, 0, 1, 1], [], []>} : vector<8x200xf32>, vector<200x256xf32>, vector<8x256xf32> -> vector<8x256xf32>
    %350 = arith.addf %347, %349 : vector<8x256xf32>
    %351 = vector.broadcast %3 : vector<8x1xf32> to vector<8x256xf32>
    %352 = arith.mulf %350, %351 : vector<8x256xf32>
    %353 = vector.broadcast %4 : vector<8x1xf32> to vector<8x256xf32>
    %354 = arith.addf %352, %353 : vector<8x256xf32>
    %cst_171 = arith.constant 0.000000e+00 : f32
    %355 = vector.broadcast %cst_171 : f32 to vector<8x256xf32>
    %356 = arith.maximumf %354, %355 : vector<8x256xf32>
    %cst_172 = arith.constant 0.000000e+00 : f32
    %357 = vector.broadcast %cst_172 : f32 to vector<8x256xf32>
    %358 = arith.minimumf %354, %357 : vector<8x256xf32>
    %359 = vector.broadcast %5 : vector<8x1xf32> to vector<8x256xf32>
    %360 = arith.mulf %359, %358 : vector<8x256xf32>
    %361 = arith.addf %356, %360 : vector<8x256xf32>
    %362 = tpu.concatenate %74, %217, %361 in 0 : vector<8x256xf32>, vector<8x256xf32>, vector<8x256xf32> -> vector<24x256xf32>
    %c0_173 = arith.constant 0 : index
    %c0_174 = arith.constant 0 : index
    %363 = vector.load %arg4[%c0_173, %c0_174] : memref<8x24xf32, #tpu.memory_space<vmem>>, vector<8x24xf32>
    %cst_175 = arith.constant dense<0.000000e+00> : vector<8x256xf32>
    %364 = tpu.matmul %363, %362, %cst_175 {dimension_numbers = #tpu.dot_dimension_numbers<[1], [0], [0], [1], [0, 0, 1, 1], [], []>} : vector<8x24xf32>, vector<24x256xf32>, vector<8x256xf32> -> vector<8x256xf32>
    %365 = vector.broadcast %6 : vector<8x1xf32> to vector<8x256xf32>
    %366 = arith.addf %364, %365 : vector<8x256xf32>
    %c0_176 = arith.constant 0 : index
    %c0_177 = arith.constant 0 : index
    %c0_178 = arith.constant 0 : index
    %367 = vector.load %arg6[%c0_176, %c0_177, %c0_178] : memref<1x8x256xf32, #tpu.memory_space<vmem>>, vector<1x8x256xf32>
    %368 = vector.shape_cast %367 : vector<1x8x256xf32> to vector<8x256xf32>
    %369 = vector.shape_cast %366 : vector<8x256xf32> to vector<1x8x256xf32>
    tpu.vector_store %arg6[%c0_176, %c0_177, %c0_178], %369 {strides = array<i32>} : memref<1x8x256xf32, #tpu.memory_space<vmem>>, vector<1x8x256xf32>,
    return
  }
  func.func @transform_0(%arg0: i32) -> (i32, i32, i32) {
    %c0_i32 = arith.constant 0 : i32
    %c0_i32_0 = arith.constant 0 : i32
    %c0_i32_1 = arith.constant 0 : i32
    return %arg0, %c0_i32, %c0_i32_0 : i32, i32, i32
  }
  func.func @transform_1(%arg0: i32) -> (i32, i32) {
    %c0_i32 = arith.constant 0 : i32
    %c0_i32_0 = arith.constant 0 : i32
    %c0_i32_1 = arith.constant 0 : i32
    return %c0_i32, %c0_i32_0 : i32, i32
  }
  func.func @transform_2(%arg0: i32) -> (i32, i32) {
    %c0_i32 = arith.constant 0 : i32
    %c0_i32_0 = arith.constant 0 : i32
    %c0_i32_1 = arith.constant 0 : i32
    return %c0_i32, %c0_i32_0 : i32, i32
  }
  func.func @transform_3(%arg0: i32) -> (i32, i32) {
    %c0_i32 = arith.constant 0 : i32
    %c0_i32_0 = arith.constant 0 : i32
    %c0_i32_1 = arith.constant 0 : i32
    return %c0_i32, %c0_i32_0 : i32, i32
  }
  func.func @transform_4(%arg0: i32) -> (i32, i32) {
    %c0_i32 = arith.constant 0 : i32
    %c0_i32_0 = arith.constant 0 : i32
    %c0_i32_1 = arith.constant 0 : i32
    return %c0_i32, %c0_i32_0 : i32, i32
  }
  func.func @transform_5(%arg0: i32) -> (i32, i32, i32) {
    %c0_i32 = arith.constant 0 : i32
    %c0_i32_0 = arith.constant 0 : i32
    %c0_i32_1 = arith.constant 0 : i32
    return %arg0, %c0_i32, %c0_i32_0 : i32, i32, i32
  }
}

</mosaic_0001>

<bundles_post_ra>
// kernel: tpu_custom_call.1
= control target key start
LH: loop header
LB: loop body
LE: loop exit
PB: predicated region body
PF: predicated region fallthrough
CT: control target
= control target key end

     0   :  { %10 = vsyncpa [#allocation4], 0  ;;  %s2902_s0 = inlined_call_operand.hbm [shape: f32[2,8,256], index: 0, kind: input, shape index: {}]   ;;  %s2903_s1 = inlined_call_operand.hbm [shape: f32[16,200], index: 1, kind: input, shape index: {}]   ;;  %s2904_s2 = inlined_call_operand.hbm [shape: f32[8,200], index: 2, kind: input, shape index: {}]   ;;  %s2905_s3 = inlined_call_operand.hbm [shape: f32[8,24], index: 3, kind: input, shape index: {}]   ;;  %s2906_s4 = inlined_call_operand.hbm [shape: f32[8,8], index: 4, kind: input, shape index: {}]   ;;  %s2907_s5 = inlined_call_operand.hbm [shape: f32[2,8,256], index: 5, kind: output, shape index: {}]  }
   0x1   :  { %12 = vsyncpa [#allocation4 + $0x1], 0 }
   0x2   :  { %13 = vsyncpa [#allocation7], 0 }
   0x3   :  { %14 = vsyncpa [#allocation10], 0 }
   0x4   :  { %15 = vsyncpa [#allocation5], 0 }
   0x5   :  { %17 = vsyncpa [#allocation5 + $0x1], 0  ;;  %s2017_s18 = smov 0   ;;  %s2019_s19 = smov 0  }
   0x6   :  { %s2021_s20 = smov 0   ;;  %s2023_s21 = smov 0  }
   0x7 LB: > { %s175_s24 = sshll.u32 %s2903_s1, 4  ;;  %s2041_s25 = sadd.s32 4294967295, %s1947_s21   ;;  %s1947_s21 = sphi %s2023_s21, %s3057_s21   ;;  %s1943_s20 = sphi %s2021_s20, %s3056_s20   ;;  %s1939_s19 = sphi %s2019_s19, %s3055_s19   ;;  %s1935_s18 = sphi %s2017_s18, %s3054_s18   ;;  %s176_s24 = int_to_ptr.hbm [resolvable:$true] %s175_s24 }
   0x8   : > { %p1441_p0 = scmp.ge.s32.totalorder %s1947_s21, 1  ;;  %p44_p1 = scmp.eq.s32.totalorder %s2041_s25, 0 }
   0x9   : > { %p164_p2 = scmp.lt.s32.totalorder %s1947_s21, 3  ;;  %s1949_s27 = smov [#allocation6]  }
   0xa   : > { %s177_s28 = sshll.u32 %s1949_s27, 4  ;;  %s202_s6 = sshll.u32 %s2905_s3, 4  ;;  %s178_s28 = int_to_ptr.vmem [resolvable:$true] %s177_s28  ;;  %s203_s6 = int_to_ptr.hbm [resolvable:$true] %s202_s6 }
   0xb   : > { %p2046_p3 = pnand %p1441_p0, %p164_p2  ;;  %s190_s10 = sshll.u32 %s2904_s2, 4  ;;  %s191_s10 = int_to_ptr.hbm [resolvable:$true] %s190_s10 }
   0xc   : > { %s1950_s11 = smov [#allocation9]   ;;  %s1951_s13 = smov 256  }
   0xd   : > { %p1572_p4 = pneg %p2046_p3  ;;  %s204_s12 = sshll.u32 %s1950_s11, 4  ;;  %s205_s12 = int_to_ptr.vmem [resolvable:$true] %s204_s12 }
   0xe   : > { %s1952_s14 = smov 16   ;;  %s214_s17 = sshll.u32 %s2906_s4, 4  ;;  %s215_s17 = int_to_ptr.hbm [resolvable:$true] %s214_s17 }
   0xf   : > { %p2058_p6 = pnand %p1572_p4, %p44_p1  ;;  %s1953_s22 = smov [#allocation8]  }
  0x10   : > { %s192_s23 = sshll.u32 %s1953_s22, 4  ;;  %s2078_s29 = sadd.s32 1, %s1947_s21   ;;  %s193_s23 = int_to_ptr.vmem [resolvable:$true] %s192_s23 }
  0x11   : > { %1575 = dma.hbm_to_vmem [thread:$0]  (!%p2058_p6), %s176_s24, 512, %s178_s28, [#allocation7], %s1951_s13, %s1951_s13, %s1952_s14  }
  0x12   : > { %1581 = dma.hbm_to_vmem [thread:$0]  (!%p2058_p6), %s203_s6, 128, %s205_s12, [#allocation10]  }
  0x13   : > { %1578 = dma.hbm_to_vmem [thread:$0]  (!%p2058_p6), %s191_s10, 256, %s193_s23, [#allocation7]  }
  0x14   : > { %s1954_s24 = smov [#allocation11]   ;;  %s1440_s28 = sadd.s32 4294967294, %s1947_s21  }
  0x15   : > { %s216_s27 = sshll.u32 %s1954_s24, 4  ;;  %s27_s30 = ssub.s32 %s1947_s21, %s2078_s29  ;;  %s217_s27 = int_to_ptr.vmem [resolvable:$true] %s216_s27 }
  0x16   : > { %1584 = dma.hbm_to_vmem [thread:$0]  (!%p2058_p6), %s215_s17, 128, %s217_s27, [#allocation10]  }
  0x17   : > { %s30_s6 = sadd.s32 1, %s1943_s20  ;;  %p28_p7 = scmp.eq.s32.totalorder %s27_s30, 0 }
  0x18   : > { %p37_p8 = scmp.ne.s32.totalorder %s1943_s20, %s1939_s19  ;;  %p38_p9 = scmp.eq.s32.totalorder %s1947_s21, 0 }
  0x19   : > { %p43_p10 = scmp.ne.s32.totalorder %s1939_s19, %s1935_s18  ;;  %p151_p13 = scmp.eq.s32.totalorder %s2041_s25, 1 }
  0x1a   : > { %s2089_s8 = scalar_select %p28_p7, %s1943_s20, %s30_s6  }
  0x1b   : > { %p2091_p11 = por %p38_p9, %p37_p8  ;;  %p2097_p12 = por %p44_p1, %p43_p10 }
  0x1c   : > { %p157_p0 = scmp.eq.s32.totalorder %s1440_s28, 1  ;;  %p1597_p2 = scmp.lt.s32.totalorder %s1947_s21, 2 }
  0x1d   : > { %s227_s10 = sand.u32 1, %s1943_s20   ;;  %p2104_p4 = por %p151_p13, %p37_p8 }
  0x1e   : > { %p2108_p6 = por %p157_p0, %p43_p10  ;;  %s1447_s13 = sshll.u32 %s227_s10, 4 }
  0x1f   : > { %s1550_s14 = sshll.u32 %s1947_s21, 4  ;;  %s231_s22 = scalar_lea.vmem [#allocation3], %s1447_s13 }
  0x20   : > { %s236_s17 = scalar_lea.hbm %s2902_s0, %s1550_s14  ;;  %s240_s23 = sshll.u32 %s231_s22, 4  ;;  %s241_s23 = int_to_ptr.vmem [resolvable:$true] %s240_s23 }
  0x21   : > { %s238_s24 = sshll.u32 %s236_s17, 4  ;;  %p2118_p7 = pnand %p1597_p2, %p2091_p11  ;;  %s239_s24 = int_to_ptr.hbm [resolvable:$true] %s238_s24 }
  0x22   : > { %s228_s28 = scalar_lea.sflag [#allocation4], %s227_s10  ;;  %s1843_s30 = sshra.s32 %s239_s24, 4  ;;  %s1844_s30 = int_to_ptr.hbm [resolvable:$true] %s1843_s30 }
  0x23   : > { %s1845_s6 = scalar_lea.hbm %s1844_s30, 16  ;;  %p1847_p9 = pneg %p2118_p7 }
  0x24   : > { %p1846_p8 = scmp.ne.s32.totalorder %s1844_s30, %s1845_s6  ;;  %s1850_s15 = scalar_lea.hbm %s2902_s0, 32 }
  0x25   : > { %p1851_p11 = scmp.lt.s32.totalorder %s1844_s30, %s2902_s0  ;;  %p1852_p0 = scmp.lt.s32.totalorder %s1850_s15, %s1845_s6 }
  0x26   : > { %p1848_p10 = pnand %p1847_p9, %p1846_p8 }
  0x27   : > { %p1853_p2 = por %p1852_p0, %p1851_p11 }
  0x28   : > { %p1849_p13 = pneg %p1848_p10 }
  0x2a   : > { %p1854_p5 = pnand %p1853_p2, %p1849_p13 }
  0x2c   : > { %1857 = shalt.err (!%p1854_p5)
}
  0x2d   : > { %1588 = dma.hbm_to_vmem [thread:$0]  (!%p2118_p7), %s239_s24, 256, %s241_s23, %s228_s28  }
  0x2e   : > { %249 = sbr.rel (%p2046_p3) target bundleno = 1042 (0x412), region = 40  ;;  %s2135_s10 = sand.u32 (!%p2046_p3), 1, %s1939_s19  }
  0x2f   : > { %s2908_s17 = sshll.u32 (!%p2046_p3), %s2135_s10, 4  ;;  %s252_s22 = scalar_lea.sflag (!%p2046_p3), [#allocation4], %s2135_s10 }
  0x30   : > { %s2141_s30 = scalar_lea.vmem (!%p2046_p3), [#allocation3], %s2908_s17 }
  0x33   : > { %1918 = dma.done.wait (%p2097_p12), %s252_s22, 256  }
  0x34   : > { %1920 = vsyncadd (%p2097_p12), %s252_s22, 4294967040 }
  0x35   : > { %1922 = dma.done.wait (%p44_p1), [#allocation7], 768  }
  0x36   : > { %1924 = vsyncadd (%p44_p1), [#allocation7], 4294966528 }
  0x37   : > { %1926 = dma.done.wait (%p44_p1), [#allocation10], 256  }
  0x38   : > { %1928 = vsyncadd (%p44_p1), [#allocation10], 4294967040  ;;  %v1955_v0 = vmov 0.0   ;;  %s2961_s26 = smov 127   ;;  %s1957_s7 = smov 126   ;;  %v2162_v1 = vld [vmem:[%s2141_s30 + $0x8] sm:$0xff]  ;;  %v304_v7 = vlaneseq }
  0x39   : > { %569 = vrot.lane.b32.xlu2 %v1955_v0, %s2961_s26  ;;  %582 = vrot.lane.b32.xlu1 %v1955_v0, %s1957_s7  ;;  %s1958_s23 = smov 114   ;;  %v2171_v2 = vld [vmem:[%s2141_s30] sm:$0xff]  ;;  %s2962_s24 = smov 1   ;;  %v1678_v4 = vpack.i.bf16 0.0, %v2162_v1  ;;  %vm2934_vm0 = vcmask 932864   ;;  %vm2931_vm2 = vcmask 1031168  }
  0x3a   : > { %595 = vrot.lane.b32.xlu0 %v1955_v0, %s1958_s23  ;;  %s2909_s27 = smov 2   ;;  %s2911_s28 = smov 14   ;;  %v1673_v3 = vpack.i.bf16 %v2162_v1, %v2171_v2  ;;  %v305_v9 = vand.u32 127, %v304_v7  ;;  %vm2930_vm4 = vcmask 1039360   ;;  %vm2929_vm6 = vcmask 7168  }
  0x3b   : > { %s2913_s6 = smov 15   ;;  %s2917_s13 = smov 16   ;;  %vm2932_vm9 = vcmask 15360   ;;  %vm2933_vm11 = vcmask 113664   ;;  %vm2936_vm14 = vcmask 121856   ;;  %vm2938_vm15 = vcmask 130048  }
  0x3c   : > { %s2915_s14 = smov 94   ;;  %s2963_s15 = smov 95   ;;  %v306_v10 = vadd.s32 128, %v305_v9  ;;  %v311_v20 = vand.u32 15, %v305_v9 }
  0x3d   : > { %s2964_s16 = smov 17   ;;  %s2919_s9 = smov 18  }
  0x3e   : > { %s2925_s22 = smov 96   ;;  %s2921_s17 = smov 97   ;;  %v318_v13 = vand.u32 15, %v306_v10  ;;  %v2274_v24 = vadd.s32 4294967294, %v311_v20  ;;  %v2299_v32 = vadd.s32 2, %v311_v20  ;;  %v2316_v38 = vadd.s32 1, %v311_v20 }
  0x3f   : > { %v2326_v41 = vadd.s32 4294967295, %v311_v20 }
  0x40   : > { %v2256_v15 = vadd.s32 4294967294, %v318_v13  ;;  %v2261_v16 = vadd.s32 2, %v318_v13  ;;  %v2266_v19 = vadd.s32 1, %v318_v13  ;;  %v2276_v25 = vadd.s32 4294967295, %v318_v13 }
  0x41   : > { %567 = vrot.lane.b32.xlu2 %v2162_v1, %s2961_s26  ;;  %580 = vrot.lane.b32.xlu1 %v2162_v1, %s1957_s7  ;;  %vm2935_vm7 = vcmp.ge.s32.totalorder %v2274_v24, 0  ;;  %vm365_vm10 = vcmp.lt.s32.totalorder %v2299_v32, 16  ;;  %vm357_vm12 = vcmp.lt.s32.totalorder %v2316_v38, 16  ;;  %vm341_vm13 = vcmp.ge.s32.totalorder %v2326_v41, 0 }
  0x42   : > { %593 = vrot.lane.b32.xlu0 %v2162_v1, %s1958_s23  ;;  %vm334_vm1 = vcmp.ge.s32.totalorder %v2256_v15, 0  ;;  %vm366_vm3 = vcmp.lt.s32.totalorder %v2261_v16, 16  ;;  %vm358_vm5 = vcmp.lt.s32.totalorder %v2266_v19, 16  ;;  %vm342_vm8 = vcmp.ge.s32.totalorder %v2276_v25, 0 }
  0x43   : > { %v1986_v25 = vmov 6  }
  0x49   : > { %548 = vrot.lane.b32.xlu2 %v2162_v1, %s2962_s24  ;;  %546 = vrot.lane.b32.xlu1 %v2171_v2, %s2962_s24 }
  0x4a   : > { %591 = vrot.lane.b32.xlu0 %v2171_v2, %s1958_s23 }
  0x51   : > { %535 = vrot.lane.b32.xlu2 %v2162_v1, %s2909_s27  ;;  %533 = vrot.lane.b32.xlu1 %v2171_v2, %s2909_s27 }
  0x52   : > { %578 = vrot.lane.b32.xlu0 %v2171_v2, %s1957_s7 }
  0x59   : > { %522 = vrot.lane.b32.xlu2 %v2162_v1, %s2911_s28  ;;  %520 = vrot.lane.b32.xlu1 %v2171_v2, %s2911_s28 }
  0x5a   : > { %565 = vrot.lane.b32.xlu0 %v2171_v2, %s2961_s26 }
  0x61   : > { %544 = vrot.lane.b32.xlu2 %v1955_v0, %s2962_s24  ;;  %509 = vrot.lane.b32.xlu1 %v2162_v1, %s2913_s6 }
  0x62   : > { %507 = vrot.lane.b32.xlu0 %v2171_v2, %s2913_s6 }
  0x69   : > { %1674 = vrot.lane.b32.xlu2 %v1673_v3, %s2917_s13  ;;  %712 = vrot.lane.b32.xlu1 %v1955_v0, %s2915_s14 }
  0x6a   : > { %710 = vrot.lane.b32.xlu0 %v2162_v1, %s2915_s14 }
  0x71   : > { %699 = vrot.lane.b32.xlu2 %v1955_v0, %s2963_s15  ;;  %697 = vrot.lane.b32.xlu1 %v2162_v1, %s2963_s15 }
  0x72   : > { %531 = vrot.lane.b32.xlu0 %v1955_v0, %s2909_s27  ;;  %s2923_s27 = smov 30  }
  0x79   : > { %518 = vrot.lane.b32.xlu2 %v1955_v0, %s2911_s28  ;;  %483 = vrot.lane.b32.xlu1 %v2162_v1, %s2964_s16  ;;  %s2927_s28 = smov 98  }
  0x7a   : > { %481 = vrot.lane.b32.xlu0 %v2171_v2, %s2964_s16 }
  0x81   : > { %470 = vrot.lane.b32.xlu2 %v2162_v1, %s2919_s9  ;;  %468 = vrot.lane.b32.xlu1 %v2171_v2, %s2919_s9 }
  0x82   : > { %1679 = vrot.lane.b32.xlu0 %v1678_v4, %s2925_s22 }
  0x89   : > { %673 = vrot.lane.b32.xlu2 %v1955_v0, %s2921_s17  ;;  %671 = vrot.lane.b32.xlu1 %v2162_v1, %s2921_s17 }
  0x8a   : > { %505 = vrot.lane.b32.xlu0 %v1955_v0, %s2913_s6  ;;  %s2955_s6 = smov 31  }
  0x91   : > { %457 = vrot.lane.b32.xlu2 %v2162_v1, %s2923_s27  ;;  %455 = vrot.lane.b32.xlu1 %v2171_v2, %s2923_s27 }
  0x92   : > { %708 = vrot.lane.b32.xlu0 %v2171_v2, %s2915_s14  ;;  %s1973_s14 = smov 110  }
  0x93   : > { %v570_v5 = vpop.permute.xlu2 %569 }
  0x99   : > { %660 = vrot.lane.b32.xlu2 %v1955_v0, %s2927_s28  ;;  %658 = vrot.lane.b32.xlu1 %v2162_v1, %s2927_s28 }
  0x9a   : > { %492 = vrot.lane.b32.xlu0 %v1955_v0, %s2917_s13  ;;  %s2951_s13 = smov 32  }
  0x9b   : > { %v2242_v6 = vpop.permute.xlu2 %567 }
  0x9c   : > { %v573_v26 = vsel %vm2930_vm4, %v2242_v6, %v570_v5 }
  0xa1   : > { %440 = vrot.lane.b32.xlu2 %v2162_v1, %s2955_s6  ;;  %438 = vrot.lane.b32.xlu1 %v2171_v2, %s2955_s6 }
  0xa2   : > { %695 = vrot.lane.b32.xlu0 %v2171_v2, %s2963_s15 }
  0xa3   : > { %v549_v8 = vpop.permute.xlu2 %548 }
  0xa9   : > { %647 = vrot.lane.b32.xlu2 %v1955_v0, %s1973_s14  ;;  %645 = vrot.lane.b32.xlu1 %v2162_v1, %s1973_s14 }
  0xaa   : > { %479 = vrot.lane.b32.xlu0 %v1955_v0, %s2964_s16 }
  0xab   : > { %v583_v11 = vpop.permute.xlu1 %582  ;;  %v536_v12 = vpop.permute.xlu2 %535 }
  0xac   : > { %v596_v14 = vpop.permute.xlu0 %595 }
  0xb1   : > { %466 = vrot.lane.b32.xlu2 %v1955_v0, %s2919_s9  ;;  %1684 = vrot.lane.b32.xlu1 %v1673_v3, %s2951_s13  ;;  %s2959_s9 = smov 111  }
  0xb2   : > { %682 = vrot.lane.b32.xlu0 %v2171_v2, %s2925_s22  ;;  %s2957_s22 = smov 112  }
  0xb3   : > { %v523_v17 = vpop.permute.xlu2 %522  ;;  %v581_v18 = vpop.permute.xlu1 %580 }
  0xb4   : > { %v594_v21 = vpop.permute.xlu0 %593  ;;  %v586_v23 = vsel %vm2931_vm2, %v581_v18, %v583_v11 }
  0xb5   : > { %v599_v22 = vsel %vm2934_vm0, %v594_v21, %v596_v14 }
  0xb6   : > { %1479 = vmatpush.msk.msra.mxu2 %vm334_vm1, %v599_v22 }
  0xb8   : > { %1480 = vmatpush.msk.msra.mxu2 %vm366_vm3, %v586_v23 }
  0xb9   : > { %669 = vrot.lane.b32.xlu2 %v2171_v2, %s2921_s17  ;;  %634 = vrot.lane.b32.xlu1 %v1955_v0, %s2959_s9  ;;  %s2949_s17 = smov 33  }
  0xba   : > { %1481 = vmatpush.msk.msra.mxu2 %vm358_vm5, %v573_v26  ;;  %632 = vrot.lane.b32.xlu0 %v2162_v1, %s2959_s9 }
  0xbb   : > { %v545_v27 = vpop.permute.xlu2 %544  ;;  %v547_v28 = vpop.permute.xlu1 %546 }
  0xbc   : > { %781 = vmatpush.msra.mxu2 %v2162_v1  ;;  %v592_v29 = vpop.permute.xlu0 %591  ;;  %v552_v30 = vsel %vm2929_vm6, %v547_v28, %v549_v8  ;;  %v551_v47 = vsel %vm2929_vm6, %v545_v27, %v547_v28  ;;  %vm2937_vm6 = vcmask 769024  }
  0xbd   : > { %v598_v31 = vsel %vm2934_vm0, %v592_v29, %v594_v21  ;;  %vm2944_vm0 = vcmask 793600  }
  0xbe   : > { %1457 = vmatpush.msk.msra.mxu0 %vm2935_vm7, %v598_v31  ;;  %1482 = vmatpush.msk.msra.mxu2 %vm342_vm8, %v552_v30 }
  0xc1   : > { %453 = vrot.lane.b32.xlu2 %v1955_v0, %s2923_s27  ;;  %406 = vrot.lane.b32.xlu1 %v2162_v1, %s2949_s17  ;;  %s2947_s27 = smov 34  }
  0xc2   : > { %404 = vrot.lane.b32.xlu0 %v2171_v2, %s2949_s17 }
  0xc3   : > { %v2307_v33 = vpop.permute.xlu2 %1674  ;;  %v534_v34 = vpop.permute.xlu1 %533 }
  0xc4   : > { %v579_v35 = vpop.permute.xlu0 %578  ;;  %v539_v36 = vsel %vm2932_vm9, %v534_v34, %v536_v12  ;;  %v1677_v45 = vunpack.i.h.bf16 %v2307_v33  ;;  %v1676_v46 = vunpack.i.l.bf16 %v2307_v33 }
  0xc5   : > { %v585_v37 = vsel %vm2931_vm2, %v579_v35, %v581_v18  ;;  %1483 = vmatpush.msk.msra.mxu2 %vm334_vm1, %v539_v36  ;;  %vm2943_vm2 = vcmask 138240  }
  0xc6   : > { %1458 = vmatpush.msk.msra.mxu0 %vm365_vm10, %v585_v37  ;;  %v500_v52 = vsel %vm2938_vm15, %v1676_v46, %v1677_v45 }
  0xc9   : > { %387 = vrot.lane.b32.xlu2 %v2171_v2, %s2947_s27  ;;  %656 = vrot.lane.b32.xlu1 %v2171_v2, %s2927_s28  ;;  %s2953_s28 = smov 113  }
  0xca   : > { %1689 = vrot.lane.b32.xlu0 %v1678_v4, %s2957_s22 }
  0xcb   : > { %v700_v39 = vpop.permute.xlu2 %699  ;;  %v521_v40 = vpop.permute.xlu1 %520 }
  0xcc   : > { %v566_v42 = vpop.permute.xlu0 %565  ;;  %v526_v43 = vsel %vm2933_vm11, %v521_v40, %v523_v17 }
  0xcd   : > { %v572_v44 = vsel %vm2930_vm4, %v566_v42, %v2242_v6  ;;  %1484 = vmatpush.msk.msra.mxu2 %vm366_vm3, %v526_v43  ;;  %vm2939_vm4 = vcmask 777216  }
  0xce   : > { %1459 = vmatpush.msk.msra.mxu0 %vm357_vm12, %v572_v44 }
  0xd0   : > { %735 = vmatpush.msra.mxu0 %v2171_v2 }
  0xd1   : > { %606 = vrot.lane.b32.xlu2 %v2162_v1, %s2953_s28  ;;  %436 = vrot.lane.b32.xlu1 %v1955_v0, %s2955_s6  ;;  %s2985_s6 = smov 96  }
  0xd2   : > { %389 = vrot.lane.b32.xlu0 %v2162_v1, %s2947_s27  ;;  %1460 = vmatpush.msk.msra.mxu0 %vm341_vm13, %v551_v47 }
  0xd3   : > { %v519_v48 = vpop.permute.xlu2 %518  ;;  %v510_v49 = vpop.permute.xlu1 %509 }
  0xd4   : > { %v508_v50 = vpop.permute.xlu0 %507  ;;  %v525_v62 = vsel %vm2933_vm11, %v519_v48, %v521_v40  ;;  %vm688_vm11 = vcmask 785408  }
  0xd5   : > { %v513_v51 = vsel %vm2936_vm14, %v508_v50, %v510_v49 }
  0xd6   : > { %1485 = vmatpush.msk.msra.mxu2 %vm358_vm5, %v513_v51 }
  0xd8   : > { %786 = vmatpush.msra.mxu2 %v500_v52 }
  0xd9   : > { %419 = vrot.lane.b32.xlu2 %v1955_v0, %s2951_s13  ;;  %643 = vrot.lane.b32.xlu1 %v2171_v2, %s1973_s14  ;;  %s2982_s13 = smov 94  }
  0xda   : > { %608 = vrot.lane.b32.xlu0 %v1955_v0, %s2953_s28 }
  0xdb   : > { %v471_v53 = vpop.permute.xlu2 %470  ;;  %v713_v54 = vpop.permute.xlu1 %712 }
  0xdc   : > { %v711_v55 = vpop.permute.xlu0 %710 }
  0xdd   : > { %v716_v56 = vsel %vm2937_vm6, %v711_v55, %v713_v54 }
  0xde   : > { %1492 = vmatpush.msk.msra.mxu3 %vm366_vm3, %v716_v56 }
  0xe1   : > { %402 = vrot.lane.b32.xlu1 %v1955_v0, %s2949_s17  ;;  %617 = vrot.lane.b32.xlu2 %v2171_v2, %s2957_s22  ;;  %s2981_s17 = smov 2   ;;  %s2986_s22 = smov 18  }
  0xe2   : > { %630 = vrot.lane.b32.xlu0 %v2171_v2, %s2959_s9  ;;  %s2987_s9 = smov 30  }
  0xe3   : > { %v674_v57 = vpop.permute.xlu2 %673  ;;  %v698_v58 = vpop.permute.xlu1 %697 }
  0xe4   : > { %v532_v59 = vpop.permute.xlu0 %531  ;;  %v703_v60 = vsel %vm2939_vm4, %v698_v58, %v700_v39 }
  0xe5   : > { %v538_v61 = vsel %vm2932_vm9, %v532_v59, %v534_v34  ;;  %1493 = vmatpush.msk.msra.mxu3 %vm358_vm5, %v703_v60  ;;  %vm2942_vm9 = vcmask 146432  }
  0xe6   : > { %1461 = vmatpush.msk.msra.mxu0 %vm2935_vm7, %v538_v61  ;;  %vm2941_vm7 = vcmask 244736  }
  0xe8   : > { %1462 = vmatpush.msk.msra.mxu0 %vm365_vm10, %v525_v62 }
  0xe9   : > { %604 = vrot.lane.b32.xlu1 %v2171_v2, %s2953_s28  ;;  %s2983_s28 = smov 15  }
  0xea   : > { %385 = vrot.lane.b32.xlu0 %v1955_v0, %s2947_s27  ;;  %s2980_s27 = smov 14  }
  0xeb   : > { %v458_v63 = vpop.permute.xlu2 %457  ;;  %v484_v1 = vpop.permute.xlu1 %483 }
  0xec   : > { %v482_v3 = vpop.permute.xlu0 %481 }
  0xed   : > { %v487_v4 = vsel %vm2943_vm2, %v482_v3, %v484_v1 }
  0xee   : > { %1486 = vmatpush.msk.msra.mxu2 %vm342_vm8, %v487_v4 }
  0xf3   : > { %v661_v5 = vpop.permute.xlu2 %660  ;;  %v469_v6 = vpop.permute.xlu1 %468 }
  0xf4   : > { %v1680_v7 = vpop.permute.xlu0 %1679  ;;  %v474_v8 = vsel %vm2942_vm9, %v469_v6, %v471_v53 }
  0xf5   : > { %v1682_v2 = vunpack.i.h.bf16 %v1680_v7  ;;  %v1681_v9 = vunpack.i.l.bf16 %v1680_v7  ;;  %1487 = vmatpush.msk.msra.mxu2 %vm334_vm1, %v474_v8  ;;  %v1981_v7 = vmov 2   ;;  %v1982_v8 = vmov 0  }
  0xf6   : > { %1695 = vset.pattern.permute.xlu1 %v1981_v7  ;;  %1693 = vset.pattern.permute.xlu2 %v1982_v8 }
  0xf7   : > { %v690_v10 = vsel %vm688_vm11, %v1681_v9, %v1682_v2 }
  0xf8   : > { %810 = vmatpush.msra.mxu3 %v690_v10 }
  0xfb   : > { %v441_v11 = vpop.permute.xlu2 %440  ;;  %v672_v12 = vpop.permute.xlu1 %671 }
  0xfc   : > { %v506_v13 = vpop.permute.xlu0 %505  ;;  %v677_v14 = vsel %vm2944_vm0, %v672_v12, %v674_v57 }
  0xfd   : > { %v512_v17 = vsel %vm2936_vm14, %v506_v13, %v508_v50  ;;  %1494 = vmatpush.msk.msra.mxu3 %vm342_vm8, %v677_v14  ;;  %vm2946_vm14 = vcmask 801792  }
  0xfe   : > { %1463 = vmatpush.msk.msra.mxu0 %vm357_vm12, %v512_v17 }
 0x103   : > { %v648_v18 = vpop.permute.xlu2 %647  ;;  %v456_v20 = vpop.permute.xlu1 %455 }
 0x104   : > { %v709_v21 = vpop.permute.xlu0 %708  ;;  %v461_v22 = vsel %vm2941_vm7, %v456_v20, %v458_v63 }
 0x105   : > { %v715_v23 = vsel %vm2937_vm6, %v709_v21, %v711_v55  ;;  %1488 = vmatpush.msk.msra.mxu2 %vm366_vm3, %v461_v22  ;;  %vm2945_vm6 = vcmask 252928   ;;  %v722_v21 = vld [vmem:[#allocation6 + $0x8] sm:$0xff] }
 0x106   : > { %1470 = vmatpush.msk.msra.mxu1 %vm365_vm10, %v715_v23 }
 0x10b   : > { %v467_v26 = vpop.permute.xlu2 %466  ;;  %v659_v27 = vpop.permute.xlu1 %658 }
 0x10c   : > { %v493_v28 = vpop.permute.xlu0 %492  ;;  %v664_v29 = vsel %vm2946_vm14, %v659_v27, %v661_v5  ;;  %v473_v44 = vsel %vm2942_vm9, %v467_v26, %v469_v6  ;;  %vm623_vm9 = vcmask 916480   ;;  %v2451_v5 = vld [vmem:[#allocation11] sm:$0xff]  ;;  %v1980_v6 = vmov 1  }
 0x10d   : > { %v499_v30 = vsel %vm2938_vm15, %v493_v28, %v1676_v46  ;;  %1495 = vmatpush.msk.msra.mxu3 %vm334_vm1, %v664_v29  ;;  %vm2940_vm15 = vcmask 900096   ;;  %1694 = vset.pattern.permute.xlu0 %v1980_v6 }
 0x10e   : > { %740 = vmatpush.msra.mxu0 %v499_v30  ;;  %832 = vperm.xlu0 %1694, %v2451_v5  }
 0x10f   : > { %842 = vperm.xlu1 %1695, %v2451_v5   ;;  %826 = vperm.xlu2 %1693, %v2451_v5  }
 0x113   : > { %v2407_v31 = vpop.permute.xlu1 %438  ;;  %v670_v34 = vpop.permute.xlu2 %669 }
 0x114   : > { %v696_v35 = vpop.permute.xlu0 %695  ;;  %v444_v36 = vsel %vm2945_vm6, %v2407_v31, %v441_v11  ;;  %v676_v52 = vsel %vm2944_vm0, %v670_v34, %v672_v12  ;;  %vm2965_vm0 = vcmask 277504   ;;  %v721_v12 = vld [vmem:[#allocation6] sm:$0xff] }
 0x115   : > { %v702_v37 = vsel %vm2939_vm4, %v696_v35, %v698_v58  ;;  %1489 = vmatpush.msk.msra.mxu2 %vm358_vm5, %v444_v36  ;;  %vm2977_vm4 = vcmp.ge.s32.totalorder %v2274_v24, 0 }
 0x116   : > { %1471 = vmatpush.msk.msra.mxu1 %vm357_vm12, %v702_v37  ;;  %989 = vrot.lane.b32.xlu0 %v1955_v0, %s2962_s24 }
 0x117   : > { %1025 = vrot.lane.b32.xlu1 %v1955_v0, %s1957_s7  ;;  %1037 = vrot.lane.b32.xlu2 %v1955_v0, %s1958_s23 }
 0x11b   : > { %v2416_v33 = vpop.permute.xlu1 %645  ;;  %v454_v43 = vpop.permute.xlu2 %453 }
 0x11c   : > { %v480_v39 = vpop.permute.xlu0 %479  ;;  %v651_v40 = vsel %vm2940_vm15, %v2416_v33, %v648_v18  ;;  %v460_v45 = vsel %vm2941_vm7, %v454_v43, %v456_v20  ;;  %vm2967_vm15 = vcmask 261120   ;;  %vm2966_vm7 = vcmask 269312  }
 0x11d   : > { %v486_v42 = vsel %vm2943_vm2, %v480_v39, %v482_v3  ;;  %1496 = vmatpush.msk.msra.mxu3 %vm366_vm3, %v651_v40  ;;  %vm2978_vm2 = vcmp.ge.s32.totalorder %v2274_v24, 0 }
 0x11e   : > { %1464 = vmatpush.msk.msra.mxu0 %vm341_vm13, %v486_v42  ;;  %1013 = vrot.lane.b32.xlu0 %v1955_v0, %s2961_s26 }
 0x11f   : > { %965 = vrot.lane.b32.xlu1 %v1955_v0, %s2980_s27  ;;  %977 = vrot.lane.b32.xlu2 %v1955_v0, %s2981_s17 }
 0x120   : > { %1465 = vmatpush.msk.msra.mxu0 %vm2977_vm4, %v473_v44  ;;  %vm636_vm4 = vcmask 908288  }
 0x122   : > { %1466 = vmatpush.msk.msra.mxu0 %vm365_vm10, %v460_v45 }
 0x123   : > { %v1685_v46 = vpop.permute.xlu1 %1684  ;;  %v2442_v56 = vpop.permute.xlu2 %387 }
 0x124   : > { %v1687_v47 = vunpack.i.h.bf16 %v1685_v46  ;;  %v1686_v48 = vunpack.i.l.bf16 %v1685_v46  ;;  %v683_v49 = vpop.permute.xlu0 %682 }
 0x125   : > { %v689_v50 = vsel %vm688_vm11, %v683_v49, %v1681_v9 }
 0x126   : > { %764 = vmatpush.msra.mxu1 %v689_v50  ;;  %v427_v51 = vsel %vm2967_vm15, %v1686_v48, %v1687_v47 }
 0x127   : > { %791 = vmatpush.msra.mxu2 %v427_v51  ;;  %1145 = vrot.lane.b32.xlu1 %v1955_v0, %s2982_s13 }
 0x128   : > { %1472 = vmatpush.msk.msra.mxu1 %vm341_vm13, %v676_v52  ;;  %953 = vrot.lane.b32.xlu2 %v1955_v0, %s2983_s28 }
 0x12b   : > { %v635_v53 = vpop.permute.xlu1 %634  ;;  %v607_v60 = vpop.permute.xlu2 %606 }
 0x12c   : > { %v2436_v54 = vpop.permute.xlu0 %632 }
 0x12d   : > { %v638_v55 = vsel %vm636_vm4, %v2436_v54, %v635_v53 }
 0x12e   : > { %1497 = vmatpush.msk.msra.mxu3 %vm358_vm5, %v638_v55 }
 0x12f   : > { %1133 = vrot.lane.b32.xlu1 %v1955_v0, %s2963_s15 }
 0x130   : > { %929 = vrot.lane.b32.xlu2 %v1955_v0, %s2964_s16 }
 0x133   : > { %v407_v57 = vpop.permute.xlu1 %406  ;;  %v420_v2 = vpop.permute.xlu2 %419 }
 0x134   : > { %v405_v58 = vpop.permute.xlu0 %404  ;;  %v426_v14 = vsel %vm2967_vm15, %v420_v2, %v1686_v48  ;;  %vm3005_vm15 = vcmask 769024  }
 0x135   : > { %v410_v59 = vsel %vm2966_vm7, %v405_v58, %v407_v57 }
 0x136   : > { %1490 = vmatpush.msk.msra.mxu2 %vm342_vm8, %v410_v59 }
 0x137   : > { %1121 = vrot.lane.b32.xlu1 %v1955_v0, %s2985_s6 }
 0x138   : > { %917 = vrot.lane.b32.xlu2 %v1955_v0, %s2986_s22 }
 0x13b   : > { %v657_v61 = vpop.permute.xlu1 %656  ;;  %v618_v26 = vpop.permute.xlu2 %617 }
 0x13c   : > { %v1690_v62 = vpop.permute.xlu0 %1689  ;;  %v663_v63 = vsel %vm2946_vm14, %v657_v61, %v659_v27  ;;  %vm2968_vm14 = vcmask 588800  }
 0x13d   : > { %v1692_v1 = vunpack.i.h.bf16 %v1690_v62  ;;  %v1691_v3 = vunpack.i.l.bf16 %v1690_v62  ;;  %1473 = vmatpush.msk.msra.mxu1 %vm2978_vm2, %v663_v63  ;;  %vm2969_vm2 = vcmask 924672  }
 0x13f   : > { %v625_v4 = vsel %vm623_vm9, %v1691_v3, %v1692_v1  ;;  %v624_v30 = vsel %vm623_vm9, %v618_v26, %v1691_v3 }
 0x140   : > { %815 = vmatpush.msra.mxu3 %v625_v4  ;;  %905 = vrot.lane.b32.xlu2 %v1955_v0, %s2987_s9 }
 0x143   : > { %v437_v9 = vpop.permute.xlu1 %436 }
 0x144   : > { %v390_v10 = vpop.permute.xlu0 %389  ;;  %v443_v11 = vsel %vm2945_vm6, %v437_v9, %v2407_v31  ;;  %vm2979_vm6 = vcmask 900096  }
 0x145   : > { %1467 = vmatpush.msk.msra.mxu0 %vm357_vm12, %v443_v11  ;;  %v393_v13 = vsel %vm2965_vm0, %v2442_v56, %v390_v10 }
 0x146   : > { %1491 = vmatpush.msk.msra.mxu2 %vm334_vm1, %v393_v13 }
 0x147   : > { %745 = vmatpush.msra.mxu0 %v426_v14  ;;  %794 = vmatmul.f32.vlgmr.msra.gmra.mxu2 %v721_v12 }
 0x14b   : > { %v644_v17 = vpop.permute.xlu1 %643 }
 0x14c   : > { %v609_v18 = vpop.permute.xlu0 %608  ;;  %v650_v20 = vsel %vm2979_vm6, %v644_v17, %v2416_v33  ;;  %vm2984_vm6 = vcmp.ge.s32.totalorder %v2274_v24, 0 }
 0x14d   : > { %1474 = vmatpush.msk.msra.mxu1 %vm365_vm10, %v650_v20  ;;  %v612_v22 = vsel %vm2969_vm2, %v607_v60, %v609_v18 }
 0x14e   : > { %1498 = vmatpush.msk.msra.mxu3 %vm342_vm8, %v612_v22 }
 0x14f   : > { %1499 = vmatmul.msk.f32.vlgmr.msra.gmra.mxu3 %vm2968_vm14, %v722_v21 }
 0x153   : > { %v403_v23 = vpop.permute.xlu1 %402 }
 0x154   : > { %v631_v27 = vpop.permute.xlu0 %630  ;;  %v409_v28 = vsel %vm2966_vm7, %v403_v23, %v405_v58  ;;  %vm3004_vm7 = vcmp.ge.s32.totalorder %v2274_v24, 0 }
 0x155   : > { %1468 = vmatpush.msk.msra.mxu0 %vm341_vm13, %v409_v28  ;;  %v637_v29 = vsel %vm636_vm4, %v631_v27, %v2436_v54 }
 0x156   : > { %1475 = vmatpush.msk.msra.mxu1 %vm357_vm12, %v637_v29 }
 0x158   : > { %769 = vmatpush.msra.mxu1 %v624_v30 }
 0x15b   : > { %v605_v31 = vpop.permute.xlu1 %604 }
 0x15c   : > { %v386_v34 = vpop.permute.xlu0 %385  ;;  %v611_v35 = vsel %vm2969_vm2, %v605_v31, %v607_v60 }
 0x15d   : > { %v392_v36 = vsel %vm2965_vm0, %v386_v34, %v2442_v56  ;;  %1476 = vmatpush.msk.msra.mxu1 %vm341_vm13, %v611_v35 }
 0x15e   : > { %1469 = vmatpush.msk.msra.mxu0 %vm2984_vm6, %v392_v36  ;;  %1477 = vmatmul.msk.f32.vlgmr.msra.gmra.mxu1 %vm2968_vm14, %v722_v21  ;;  %vm3002_vm6 = vcmask 932864  }
 0x15f   : > { %748 = vmatmul.f32.vlgmr.msra.gmra.mxu0 %v721_v12  ;;  %vm3003_vm0 = vmmov %vm3002_vm6 }
 0x169   : > { %v827_v40 = vpop.permute.xlu2 %826 }
 0x171   : > { %v2544_v60 = vpop.permute.xlu2 %1037 }
 0x179   : > { %v2559_v62 = vpop.permute.xlu2 %977 }
 0x180   : > { %v833_v43 = vpop.permute.xlu0 %832 }
 0x181   : > { %v843_v46 = vpop.permute.xlu1 %842 }
 0x182   : > { %v2567_v63 = vpop.permute.xlu2 %953 }
 0x188   : > { %v2610_v10 = vpop.permute.xlu0 %989 }
 0x189   : > { %v2581_v3 = vpop.permute.xlu1 %1025 }
 0x18a   : > { %v2575_v1 = vpop.permute.xlu2 %929 }
 0x190   : > { %v1014_v13 = vpop.permute.xlu0 %1013 }
 0x191   : > { %v2592_v6 = vpop.permute.xlu1 %965 }
 0x192   : > { %v2585_v4 = vpop.permute.xlu2 %917 }
 0x199   : > { %v1146_v8 = vpop.permute.xlu1 %1145 }
 0x19a   : > { %v2600_v7 = vpop.permute.xlu2 %905 }
 0x1a1   : > { %v2608_v9 = vpop.permute.xlu1 %1133 }
 0x1a9   : > { %v2621_v12 = vpop.permute.xlu1 %1121 }
 0x1ca   : > { %v795_v50 = vpop.f32.mrf.mxu2 }
 0x1d2   : > { %v818_v51 = vpop.f32.mrf.mxu3 }
 0x1d3   : > { %v819_v52 = vadd.f32 %v818_v51, %v795_v50 }
 0x1d5   : > { %v830_v53 = vmul.f32 %v827_v40, %v819_v52 }
 0x1d7   : > { %v836_v54 = vadd.f32 %v833_v43, %v830_v53 }
 0x1d9   : > { %v840_v55 = vmin.f32 %v836_v54, 0.0  ;;  %v838_v56 = vmax.f32 %v836_v54, 0.0 }
 0x1db   : > { %v772_v37 = vpop.f32.mrf.mxu1  ;;  %v846_v57 = vmul.f32 %v843_v46, %v840_v55 }
 0x1dc   : > { %v749_v33 = vpop.f32.mrf.mxu0 }
 0x1dd   : > { %v773_v39 = vadd.f32 %v772_v37, %v749_v33  ;;  %v2535_v58 = vadd.f32 %v846_v57, %v838_v56 }
 0x1df   : > { %v829_v42 = vmul.f32 %v827_v40, %v773_v39 }
 0x1e1   : > { %v835_v44 = vadd.f32 %v833_v43, %v829_v42 }
 0x1e3   : > { %v839_v45 = vmin.f32 %v835_v44, 0.0  ;;  %v837_v47 = vmax.f32 %v835_v44, 0.0 }
 0x1e5   : > { %v845_v48 = vmul.f32 %v843_v46, %v839_v45 }
 0x1e7   : > { %v2515_v49 = vadd.f32 %v845_v48, %v837_v47 }
 0x1e9   : > { %1141 = vrot.lane.b32.xlu0 %v2515_v49, %s2982_s13  ;;  %1009 = vrot.lane.b32.xlu1 %v2515_v49, %s2961_s26  ;;  %s2988_s26 = smov 97   ;;  %v1696_v59 = vpack.i.bf16 %v2515_v49, %v1955_v0  ;;  %v1701_v61 = vpack.i.bf16 %v2535_v58, %v2515_v49 }
 0x1ea   : > { %1033 = vrot.lane.b32.xlu2 %v2515_v49, %s1958_s23 }
 0x1f1   : > { %979 = vrot.lane.b32.xlu0 %v2515_v49, %s2981_s17  ;;  %991 = vrot.lane.b32.xlu1 %v2515_v49, %s2962_s24  ;;  %s2989_s24 = smov 16  }
 0x1f2   : > { %1021 = vrot.lane.b32.xlu2 %v2515_v49, %s1957_s7 }
 0x1f9   : > { %955 = vrot.lane.b32.xlu0 %v2515_v49, %s2983_s28  ;;  %1105 = vrot.lane.b32.xlu1 %v2515_v49, %s2988_s26 }
 0x1fa   : > { %1129 = vrot.lane.b32.xlu2 %v2515_v49, %s2963_s15  ;;  %s2990_s15 = smov 98  }
 0x201   : > { %1697 = vrot.lane.b32.xlu0 %v1696_v59, %s2989_s24  ;;  %1035 = vrot.lane.b32.xlu1 %v2535_v58, %s1958_s23  ;;  %s2991_s23 = smov 1  }
 0x202   : > { %967 = vrot.lane.b32.xlu2 %v2515_v49, %s2980_s27 }
 0x209   : > { %931 = vrot.lane.b32.xlu0 %v2515_v49, %s2964_s16  ;;  %1143 = vrot.lane.b32.xlu1 %v2535_v58, %s2982_s13  ;;  %s2992_s13 = smov 111   ;;  %s2993_s16 = smov 95  }
 0x20a   : > { %1093 = vrot.lane.b32.xlu2 %v2515_v49, %s2990_s15 }
 0x211   : > { %919 = vrot.lane.b32.xlu0 %v2515_v49, %s2986_s22  ;;  %1702 = vrot.lane.b32.xlu1 %v1701_v61, %s2985_s6  ;;  %s2994_s6 = smov 127  }
 0x212   : > { %1081 = vrot.lane.b32.xlu2 %v2515_v49, %s1973_s14 }
 0x219   : > { %1023 = vrot.lane.b32.xlu0 %v2535_v58, %s1957_s7  ;;  %993 = vrot.lane.b32.xlu1 %v2535_v58, %s2991_s23  ;;  %s2996_s7 = smov 31   ;;  %s3000_s23 = smov 33  }
 0x21a   : > { %1069 = vrot.lane.b32.xlu2 %v2515_v49, %s2992_s13 }
 0x221   : > { %1131 = vrot.lane.b32.xlu0 %v2535_v58, %s2993_s16  ;;  %981 = vrot.lane.b32.xlu1 %v2535_v58, %s2981_s17  ;;  %s2995_s17 = smov 112   ;;  %s2999_s16 = smov 17  }
 0x222   : > { %1011 = vrot.lane.b32.xlu2 %v2535_v58, %s2994_s6 }
 0x229   : > { %1095 = vrot.lane.b32.xlu0 %v2535_v58, %s2990_s15  ;;  %969 = vrot.lane.b32.xlu1 %v2535_v58, %s2980_s27  ;;  %s2997_s27 = smov 113  }
 0x22a   : > { %1107 = vrot.lane.b32.xlu2 %v2535_v58, %s2988_s26 }
 0x231   : > { %1083 = vrot.lane.b32.xlu0 %v2535_v58, %s1973_s14  ;;  %957 = vrot.lane.b32.xlu1 %v2535_v58, %s2983_s28  ;;  %s2998_s28 = smov 32  }
 0x232   : > { %1707 = vrot.lane.b32.xlu2 %v1701_v61, %s2995_s17 }
 0x239   : > { %1071 = vrot.lane.b32.xlu0 %v2535_v58, %s2992_s13  ;;  %893 = vrot.lane.b32.xlu1 %v1955_v0, %s2996_s7 }
 0x23a   : > { %895 = vrot.lane.b32.xlu2 %v2515_v49, %s2996_s7 }
 0x241   : > { %907 = vrot.lane.b32.xlu0 %v2515_v49, %s2987_s9  ;;  %1045 = vrot.lane.b32.xlu1 %v2515_v49, %s2997_s27 }
 0x242   : > { %1047 = vrot.lane.b32.xlu2 %v2535_v58, %s2997_s27 }
 0x244   : > { %v1034_v2 = vpop.permute.xlu2 %1033 }
 0x249   : > { %1109 = vrot.lane.b32.xlu0 %v1955_v0, %s2988_s26  ;;  %1712 = vrot.lane.b32.xlu1 %v1696_v59, %s2998_s28  ;;  %s3001_s26 = smov 34  }
 0x24a   : > { %933 = vrot.lane.b32.xlu2 %v2535_v58, %s2999_s16  ;;  %s1893_s16 = scalar_lea.hbm %s2907_s5, 32 }
 0x24c   : > { %v1022_v11 = vpop.permute.xlu2 %1021 }
 0x251   : > { %945 = vrot.lane.b32.xlu0 %v2535_v58, %s2989_s24  ;;  %869 = vrot.lane.b32.xlu1 %v1955_v0, %s3000_s23  ;;  %s3052_s24 = sshll.u32 %s2135_s10, 4 }
 0x252   : > { %871 = vrot.lane.b32.xlu2 %v2515_v49, %s3000_s23 }
 0x254   : > { %v1130_v14 = vpop.permute.xlu2 %1129 }
 0x259   : > { %1097 = vrot.lane.b32.xlu0 %v1955_v0, %s2990_s15  ;;  %1073 = vrot.lane.b32.xlu1 %v1955_v0, %s2992_s13  ;;  %s1551_s15 = sshll.u32 %s2041_s25, 4 }
 0x25a   : > { %857 = vrot.lane.b32.xlu2 %v1955_v0, %s3001_s26  ;;  %s1327_s13 = scalar_lea.hbm %s2907_s5, %s1551_s15 }
 0x25b   : > { %v1142_v17 = vpop.permute.xlu0 %1141  ;;  %v1010_v18 = vpop.permute.xlu1 %1009 }
 0x25c   : > { %v2631_v20 = vpop.permute.xlu2 %967 }
 0x261   : > { %1085 = vrot.lane.b32.xlu0 %v1955_v0, %s1973_s14  ;;  %909 = vrot.lane.b32.xlu1 %v2535_v58, %s2987_s9  ;;  %s302_s14 = scalar_lea.vmem [#allocation12], %s3052_s24 }
 0x262   : > { %1061 = vrot.lane.b32.xlu2 %v1955_v0, %s2995_s17  ;;  %s1329_s6 = sshll.u32 %s302_s14, 4  ;;  %s1331_s17 = sshll.u32 %s1327_s13, 4  ;;  %s1330_s6 = int_to_ptr.vmem [resolvable:$true] %s1329_s6  ;;  %s1332_s17 = int_to_ptr.hbm [resolvable:$true] %s1331_s17 }
 0x263   : > { %v980_v21 = vpop.permute.xlu0 %979  ;;  %v992_v22 = vpop.permute.xlu1 %991 }
 0x264   : > { %v2639_v23 = vpop.permute.xlu2 %1093 }
 0x269   : > { %921 = vrot.lane.b32.xlu0 %v2535_v58, %s2986_s22  ;;  %1049 = vrot.lane.b32.xlu1 %v1955_v0, %s2997_s27 }
 0x26a   : > { %885 = vrot.lane.b32.xlu2 %v2535_v58, %s2998_s28 }
 0x26b   : > { %v2647_v26 = vpop.permute.xlu0 %955  ;;  %v1106_v27 = vpop.permute.xlu1 %1105 }
 0x26c   : > { %v2649_v28 = vpop.permute.xlu2 %1081 }
 0x271   : > { %859 = vrot.lane.b32.xlu0 %v2515_v49, %s3001_s26  ;;  %861 = vrot.lane.b32.xlu1 %v2535_v58, %s3001_s26 }
 0x273   : > { %v2655_v29 = vpop.permute.xlu0 %1697  ;;  %v1036_v30 = vpop.permute.xlu1 %1035 }
 0x274   : > { %v1039_v31 = vsel %vm3002_vm6, %v1034_v2, %v1036_v30  ;;  %v1040_v0 = vsel %vm3003_vm0, %v1036_v30, %v2544_v60  ;;  %v2666_v34 = vpop.permute.xlu2 %1069  ;;  %vm3006_vm6 = vmmov %vm3005_vm15  ;;  %vm3007_vm0 = vcmask 1031168  }
 0x275   : > { %1501 = vmatpush.msk.msrb.mxu1 %vm3004_vm7, %v1039_v31  ;;  %1522 = vmatpush.msk.msrb.mxu0 %vm334_vm1, %v1040_v0  ;;  %vm3008_vm7 = vmmov %vm3007_vm0 }
 0x279   : > { %897 = vrot.lane.b32.xlu0 %v2535_v58, %s2996_s7  ;;  %s1887_s7 = sshra.s32 %s1332_s17, 4  ;;  %s1888_s7 = int_to_ptr.hbm [resolvable:$true] %s1887_s7 }
 0x27a   : > { %s1889_s27 = scalar_lea.hbm %s1888_s7, 16  ;;  %p1894_p12 = scmp.lt.s32.totalorder %s1888_s7, %s2907_s5 }
 0x27b   : > { %v2668_v35 = vpop.permute.xlu0 %931  ;;  %v1144_v36 = vpop.permute.xlu1 %1143  ;;  %p1890_p1 = scmp.ne.s32.totalorder %s1888_s7, %s1889_s27  ;;  %p1895_p7 = scmp.lt.s32.totalorder %s1893_s16, %s1889_s27 }
 0x27c   : > { %v1147_v37 = vsel %vm3005_vm15, %v1142_v17, %v1144_v36  ;;  %v1148_v33 = vsel %vm3006_vm6, %v1144_v36, %v1146_v8  ;;  %v1012_v42 = vpop.permute.xlu2 %1011  ;;  %vm3009_vm15 = vcmask 1039360   ;;  %v1699_v8 = vunpack.i.l.bf16 %v2655_v29 }
 0x27d   : > { %1514 = vmatpush.msk.msrb.mxu3 %vm365_vm10, %v1147_v37  ;;  %1535 = vmatpush.msk.msrb.mxu2 %vm366_vm3, %v1148_v33  ;;  %v1015_v48 = vsel %vm3009_vm15, %v1010_v18, %v1012_v42  ;;  %vm3010_vm6 = vmmov %vm3009_vm15  ;;  %vm3013_vm15 = vcmask 15360   ;;  %p1891_p3 = pnand %p1890_p1, %p2104_p4  ;;  %p1896_p8 = por %p1895_p7, %p1894_p12 }
 0x27e   : > { %v1016_v50 = vsel %vm3010_vm6, %v1012_v42, %v1014_v13  ;;  %v983_v57 = vsel %vm3013_vm15, %v2559_v62, %v980_v21  ;;  %vm3014_vm6 = vcmask 777216   ;;  %vm3015_vm14 = vmmov %vm3013_vm15  ;;  %vm3021_vm15 = vcmask 130048  }
 0x27f   : > { %vm3016_vm2 = vmmov %vm3014_vm6  ;;  %p1892_p5 = pneg %p1891_p3 }
 0x281   : > { %873 = vrot.lane.b32.xlu0 %v2535_v58, %s3000_s23  ;;  %p1897_p9 = pnand %p1896_p8, %p1892_p5 }
 0x283   : > { %v2678_v39 = vpop.permute.xlu0 %919  ;;  %v1703_v40 = vpop.permute.xlu1 %1702 }
 0x284   : > { %v2687_v47 = vpop.permute.xlu2 %1107  ;;  %v1705_v51 = vunpack.i.h.bf16 %v1703_v40  ;;  %v1704_v52 = vunpack.i.l.bf16 %v1703_v40 }
 0x286   : > { %v1123_v2 = vsel %vm688_vm11, %v1704_v52, %v1705_v51 }
 0x28b   : > { %v1024_v43 = vpop.permute.xlu0 %1023  ;;  %v994_v44 = vpop.permute.xlu1 %993 }
 0x28c   : > { %v1027_v45 = vsel %vm3007_vm0, %v1022_v11, %v1024_v43  ;;  %v1028_v46 = vsel %vm3008_vm7, %v1024_v43, %v2581_v3  ;;  %vm3011_vm0 = vcmask 7168   ;;  %v1700_v3 = vunpack.i.h.bf16 %v2655_v29 }
 0x28d   : > { %1502 = vmatpush.msk.msrb.mxu1 %vm365_vm10, %v1027_v45  ;;  %1523 = vmatpush.msk.msrb.mxu0 %vm366_vm3, %v1028_v46  ;;  %v995_v53 = vsel %vm3011_vm0, %v2610_v10, %v992_v22  ;;  %vm3012_vm7 = vmmov %vm3011_vm0  ;;  %vm3017_vm0 = vcmp.ge.s32.totalorder %v2274_v24, 0  ;;  %v2728_v10 = vpop.permute.xlu2 %1707 }
 0x28e   : > { %v996_v54 = vsel %vm3012_vm7, %v992_v22, %v994_v44  ;;  %vm3020_vm7 = vcmask 793600   ;;  %v1709_v30 = vunpack.i.l.bf16 %v2728_v10  ;;  %v724_v44 = vld [vmem:[#allocation6 + $0x18] sm:$0xff] }
 0x28f   : > { %1503 = vmatpush.msk.msrb.mxu1 %vm357_vm12, %v1015_v48  ;;  %1524 = vmatpush.msk.msrb.mxu0 %vm358_vm5, %v1016_v50  ;;  %v1111_v13 = vsel %vm3020_vm7, %v1106_v27, %v2687_v47  ;;  %v1154_v50 = vld [vmem:[#allocation8 + $0x8] sm:$0xff] }
 0x291   : > { %1161 = vmatpush.msrb.mxu1 %v2515_v49  ;;  %1201 = vmatpush.msrb.mxu0 %v2535_v58 }
 0x293   : > { %v1132_v55 = vpop.permute.xlu0 %1131  ;;  %v982_v56 = vpop.permute.xlu1 %981  ;;  %1504 = vmatpush.msk.msrb.mxu1 %vm341_vm13, %v995_v53  ;;  %1525 = vmatpush.msk.msrb.mxu0 %vm342_vm8, %v996_v54 }
 0x294   : > { %v1135_v59 = vsel %vm3014_vm6, %v1130_v14, %v1132_v55  ;;  %v984_v60 = vsel %vm3015_vm14, %v980_v21, %v982_v56  ;;  %v1136_v61 = vsel %vm3016_vm2, %v1132_v55, %v2608_v9  ;;  %vm3018_vm14 = vcmask 113664  }
 0x295   : > { %1505 = vmatpush.msk.msrb.mxu1 %vm3017_vm0, %v983_v57  ;;  %1515 = vmatpush.msk.msrb.mxu3 %vm357_vm12, %v1135_v59  ;;  %v971_v62 = vsel %vm3018_vm14, %v2592_v6, %v2631_v20  ;;  %v1124_v9 = vsel %vm688_vm11, %v1705_v51, %v2621_v12  ;;  %vm3019_vm2 = vcmask 121856   ;;  %v947_v6 = vsel %vm3021_vm15, %v1699_v8, %v1700_v3  ;;  %vm3024_vm0 = vmmov %vm3018_vm14  ;;  %v2763_v21 = vpop.permute.xlu2 %895  ;;  %v723_v51 = vld [vmem:[#allocation6 + $0x10] sm:$0xff] }
 0x296   : > { %1526 = vmatpush.msk.msrb.mxu0 %vm334_vm1, %v984_v60  ;;  %1536 = vmatpush.msk.msrb.mxu2 %vm358_vm5, %v1136_v61  ;;  %v959_v11 = vsel %vm3019_vm2, %v2567_v63, %v2647_v26  ;;  %vm3022_vm11 = vcmask 138240   ;;  %vm3023_vm6 = vcmask 801792   ;;  %vm3025_vm14 = vcmp.ge.s32.totalorder %v2274_v24, 0 }
 0x297   : > { %1506 = vmatpush.msk.msrb.mxu1 %vm365_vm10, %v971_v62  ;;  %1187 = vmatpush.msrb.mxu3 %v1123_v2  ;;  %v935_v63 = vsel %vm3022_vm11, %v2575_v1, %v2668_v35  ;;  %vm3026_vm2 = vcmask 146432   ;;  %vm3027_vm7 = vmmov %vm3025_vm14  ;;  %vm3028_vm15 = vcmask 900096   ;;  %vm3029_vm11 = vcmask 121856  }
 0x298   : > { %1227 = vmatpush.msrb.mxu2 %v1124_v9  ;;  %v923_v1 = vsel %vm3026_vm2, %v2585_v4, %v2678_v39  ;;  %v1710_v4 = vunpack.i.h.bf16 %v2728_v10  ;;  %vm3033_vm2 = vcmask 588800   ;;  %751 = vmatmul.f32.gmra.mxu0 %v723_v51  ;;  %v1983_v62 = vmov 4  }
 0x299   : > { %1507 = vmatpush.msk.msrb.mxu1 %vm357_vm12, %v959_v11  ;;  %1516 = vmatpush.msk.msrb.mxu3 %vm341_vm13, %v1111_v13  ;;  %v1984_v9 = vmov 5   ;;  %v1985_v10 = vmov 3  }
 0x29a   : > { %1500 = vmatmul.msk.f32.gmra.mxu3 %vm3033_vm2, %v724_v44  ;;  %797 = vmatmul.f32.gmra.mxu2 %v723_v51 }
 0x29b   : > { %v2742_v12 = vpop.permute.xlu0 %1095  ;;  %v970_v14 = vpop.permute.xlu1 %969  ;;  %1166 = vmatpush.msrb.mxu1 %v947_v6  ;;  %1717 = vset.pattern.permute.xlu0 %v1983_v62 }
 0x29c   : > { %v1099_v17 = vsel %vm3023_vm6, %v2639_v23, %v2742_v12  ;;  %v972_v18 = vsel %vm3024_vm0, %v2631_v20, %v970_v14  ;;  %vm3030_vm6 = vcmask 244736   ;;  %vm3031_vm0 = vcmask 924672   ;;  %1247 = vperm.xlu0 %1717, %v2451_v5   ;;  %1718 = vset.pattern.permute.xlu1 %v1984_v9 }
 0x29d   : > { %1508 = vmatpush.msk.msrb.mxu1 %vm341_vm13, %v935_v63  ;;  %1517 = vmatpush.msk.msrb.mxu3 %vm3025_vm14, %v1099_v17  ;;  %v2775_v36 = vpop.permute.xlu2 %1047  ;;  %vm3032_vm14 = vcmask 252928   ;;  %v1153_v17 = vld [vmem:[#allocation8] sm:$0xff] }
 0x29e   : > { %1527 = vmatpush.msk.msrb.mxu0 %vm366_vm3, %v972_v18  ;;  %1257 = vperm.xlu1 %1718, %v2451_v5  }
 0x29f   : > { %1509 = vmatpush.msk.msrb.mxu1 %vm3027_vm7, %v923_v1  ;;  %vm3034_vm7 = vmmov %vm3033_vm2  ;;  %1716 = vset.pattern.permute.xlu2 %v1985_v10 }
 0x2a0   : > { %1478 = vmatmul.msk.f32.gmra.mxu1 %vm3034_vm7, %v724_v44  ;;  %1241 = vperm.xlu2 %1716, %v2451_v5  }
 0x2a3   : > { %v1084_v22 = vpop.permute.xlu0 %1083  ;;  %v958_v20 = vpop.permute.xlu1 %957 }
 0x2a4   : > { %v1087_v23 = vsel %vm3028_vm15, %v2649_v28, %v1084_v22  ;;  %v960_v27 = vsel %vm3029_vm11, %v2647_v26, %v958_v20  ;;  %v1063_v26 = vsel %vm623_vm9, %v1709_v30, %v1710_v4  ;;  %vm3036_vm15 = vcmask 261120   ;;  %1720 = vset.pattern.permute.xlu0 %v1986_v25 }
 0x2a5   : > { %1518 = vmatpush.msk.msrb.mxu3 %vm365_vm10, %v1087_v23  ;;  %1528 = vmatpush.msk.msrb.mxu0 %vm358_vm5, %v960_v27  ;;  %vm3038_vm11 = vcmask 269312  }
 0x2a8   : > { %1719 = vset.pattern.permute.xlu2 %v1986_v25 }
 0x2a9   : > { %1266 = vperm.xlu2 %1719, %v2451_v5  }
 0x2ab   : > { %v1072_v31 = vpop.permute.xlu0 %1071  ;;  %v894_v0 = vpop.permute.xlu1 %893 }
 0x2ac   : > { %v1075_v28 = vsel %vm636_vm4, %v2666_v34, %v1072_v31  ;;  %v934_v34 = vpop.permute.xlu2 %933  ;;  %v899_v43 = vsel %vm3032_vm14, %v894_v0, %v2763_v21  ;;  %vm3041_vm14 = vcmask 801792  }
 0x2ad   : > { %1519 = vmatpush.msk.msrb.mxu3 %vm357_vm12, %v1075_v28 }
 0x2af   : > { %1192 = vmatpush.msrb.mxu3 %v1063_v26 }
 0x2b3   : > { %v2782_v37 = vpop.permute.xlu0 %907  ;;  %v1046_v33 = vpop.permute.xlu1 %1045 }
 0x2b4   : > { %v911_v40 = vsel %vm3030_vm6, %v2600_v7, %v2782_v37  ;;  %v1051_v42 = vsel %vm3031_vm0, %v1046_v33, %v2775_v36  ;;  %v872_v52 = vpop.permute.xlu2 %871  ;;  %vm3039_vm6 = vcmask 130048   ;;  %vm3040_vm0 = vcmask 138240  }
 0x2b5   : > { %1510 = vmatpush.msk.msrb.mxu1 %vm365_vm10, %v911_v40  ;;  %1520 = vmatpush.msk.msrb.mxu3 %vm341_vm13, %v1051_v42  ;;  %vm3035_vm10 = vcmask 793600   ;;  %v936_v56 = vsel %vm3040_vm0, %v2668_v35, %v934_v34 }
 0x2b7   : > { %1511 = vmatpush.msk.msrb.mxu1 %vm357_vm12, %v899_v43  ;;  %vm3037_vm12 = vmmov %vm3033_vm2  ;;  %vm3042_vm2 = vcmask 900096  }
 0x2b8   : > { %1521 = vmatmul.msk.f32.vlgmr.msrb.gmra.mxu3 %vm3037_vm12, %v1154_v50  ;;  %vm3048_vm12 = vcmask 252928  }
 0x2bb   : > { %v1110_v7 = vpop.permute.xlu0 %1109  ;;  %v2799_v45 = vpop.permute.xlu1 %1712 }
 0x2bc   : > { %v1715_v32 = vunpack.i.h.bf16 %v2799_v45  ;;  %v1714_v46 = vunpack.i.l.bf16 %v2799_v45  ;;  %v1112_v48 = vsel %vm3035_vm10, %v2687_v47, %v1110_v7  ;;  %v858_v57 = vpop.permute.xlu2 %857  ;;  %vm3046_vm10 = vcmask 277504  }
 0x2bd   : > { %1537 = vmatpush.msk.msrb.mxu2 %vm342_vm8, %v1112_v48 }
 0x2be   : > { %v887_v38 = vsel %vm3036_vm15, %v1714_v46, %v1715_v32  ;;  %vm3047_vm15 = vcmp.ge.s32.totalorder %v2274_v24, 0 }
 0x2bf   : > { %1171 = vmatpush.msrb.mxu1 %v887_v38 }
 0x2c3   : > { %v946_v53 = vpop.permute.xlu0 %945  ;;  %v870_v54 = vpop.permute.xlu1 %869 }
 0x2c4   : > { %v875_v55 = vsel %vm3038_vm11, %v870_v54, %v872_v52  ;;  %v948_v47 = vsel %vm3039_vm6, %v1700_v3, %v946_v53  ;;  %v1062_v8 = vpop.permute.xlu2 %1061  ;;  %vm3049_vm11 = vcmask 261120   ;;  %vm3051_vm6 = vmmov %vm3046_vm10 }
 0x2c5   : > { %1512 = vmatpush.msk.msrb.mxu1 %vm341_vm13, %v875_v55  ;;  %1206 = vmatpush.msrb.mxu0 %v948_v47  ;;  %v1064_v2 = vsel %vm623_vm9, %v1710_v4, %v1062_v8  ;;  %vm3043_vm13 = vcmask 146432   ;;  %vm3045_vm9 = vcmask 244736  }
 0x2c7   : > { %1529 = vmatpush.msk.msrb.mxu0 %vm342_vm8, %v936_v56 }
 0x2cb   : > { %v1098_v59 = vpop.permute.xlu0 %1097  ;;  %v1074_v60 = vpop.permute.xlu1 %1073 }
 0x2cc   : > { %v1100_v61 = vsel %vm3041_vm14, %v2742_v12, %v1098_v59  ;;  %v1076_v35 = vsel %vm636_vm4, %v1072_v31, %v1074_v60  ;;  %vm3044_vm4 = vcmask 924672   ;;  %v886_v18 = vpop.permute.xlu2 %885 }
 0x2cd   : > { %1538 = vmatpush.msk.msrb.mxu2 %vm334_vm1, %v1100_v61  ;;  %v888_v20 = vsel %vm3049_vm11, %v1715_v32, %v886_v18  ;;  %v1264_v32 = vld [vmem:[#allocation9] sm:$0xff] }
 0x2d3   : > { %v1086_v29 = vpop.permute.xlu0 %1085  ;;  %v910_v3 = vpop.permute.xlu1 %909 }
 0x2d4   : > { %v1088_v41 = vsel %vm3042_vm2, %v1084_v22, %v1086_v29  ;;  %v912_v14 = vsel %vm3045_vm9, %v2782_v37, %v910_v3 }
 0x2d5   : > { %1539 = vmatpush.msk.msrb.mxu2 %vm366_vm3, %v1088_v41 }
 0x2d7   : > { %1540 = vmatpush.msk.msrb.mxu2 %vm358_vm5, %v1076_v35 }
 0x2d9   : > { %1232 = vmatpush.msrb.mxu2 %v1064_v2 }
 0x2db   : > { %v922_v11 = vpop.permute.xlu0 %921  ;;  %v1050_v13 = vpop.permute.xlu1 %1049 }
 0x2dc   : > { %v924_v6 = vsel %vm3043_vm13, %v2678_v39, %v922_v11  ;;  %v1052_v12 = vsel %vm3044_vm4, %v2775_v36, %v1050_v13 }
 0x2dd   : > { %1530 = vmatpush.msk.msrb.mxu0 %vm334_vm1, %v924_v6  ;;  %1541 = vmatpush.msk.msrb.mxu2 %vm342_vm8, %v1052_v12 }
 0x2de   : > { %1542 = vmatmul.msk.f32.vlgmr.msrb.gmra.mxu2 %vm3034_vm7, %v1154_v50  ;;  %v1721_v50 = vld [vmem:[%s2141_s30] sm:$0xff] }
 0x2df   : > { %1531 = vmatpush.msk.msrb.mxu0 %vm366_vm3, %v912_v14  ;;  %vm3050_vm3 = vcmask 269312  }
 0x2e3   : > { %v860_v63 = vpop.permute.xlu0 %859  ;;  %v862_v16 = vpop.permute.xlu1 %861 }
 0x2e4   : > { %v863_v39 = vsel %vm3046_vm10, %v858_v57, %v860_v63  ;;  %v864_v24 = vsel %vm3051_vm6, %v860_v63, %v862_v16 }
 0x2e5   : > { %1513 = vmatpush.msk.msrb.mxu1 %vm3047_vm15, %v863_v39 }
 0x2e6   : > { %1174 = vmatmul.f32.vlgmr.msrb.gmra.mxu1 %v1153_v17 }
 0x2eb   : > { %v898_v1 = vpop.permute.xlu0 %897 }
 0x2ec   : > { %v900_v22 = vsel %vm3048_vm12, %v2763_v21, %v898_v1 }
 0x2ed   : > { %1532 = vmatpush.msk.msrb.mxu0 %vm358_vm5, %v900_v22 }
 0x2ef   : > { %1211 = vmatpush.msrb.mxu0 %v888_v20 }
 0x2f3   : > { %v874_v23 = vpop.permute.xlu0 %873 }
 0x2f4   : > { %v876_v27 = vsel %vm3050_vm3, %v872_v52, %v874_v23 }
 0x2f5   : > { %1533 = vmatpush.msk.msrb.mxu0 %vm342_vm8, %v876_v27 }
 0x2f7   : > { %1534 = vmatpush.msk.msrb.mxu0 %vm334_vm1, %v864_v24  ;;  %vm1269_vm1 = vcmask 195584  }
 0x2f8   : > { %1214 = vmatmul.f32.vlgmr.msrb.gmra.mxu0 %v1153_v17 }
 0x2fa   : > { %v1242_v28 = vpop.permute.xlu2 %1241 }
 0x303   : > { %v1267_v56 = vpop.permute.xlu2 %1266 }
 0x30e   : > { %v1248_v37 = vpop.permute.xlu0 %1247 }
 0x310   : > { %v1258_v15 = vpop.permute.xlu1 %1257 }
 0x315   : > { %v752_v19 = vpop.f32.mrf.mxu0 }
 0x31d   : > { %v821_v21 = vpop.f32.mrf.mxu3  ;;  %v775_v4 = vpop.f32.mrf.mxu1 }
 0x31e   : > { %v776_v31 = vadd.f32 %v775_v4, %v752_v19  ;;  %v798_v42 = vpop.f32.mrf.mxu2 }
 0x31f   : > { %v822_v48 = vadd.f32 %v821_v21, %v798_v42 }
 0x33b   : > { %v1195_v30 = vpop.f32.mrf.mxu3 }
 0x361   : > { %v1235_v45 = vpop.f32.mrf.mxu2 }
 0x363   : > { %v1175_v0 = vpop.f32.mrf.mxu1 }
 0x364   : > { %v1196_v36 = vadd.f32 %v1195_v30, %v1175_v0 }
 0x366   : > { %v1238_v26 = vadd.f32 %v1196_v36, %v776_v31 }
 0x368   : > { %v1244_v33 = vmul.f32 %v1242_v28, %v1238_v26 }
 0x36a   : > { %v1250_v40 = vadd.f32 %v1248_v37, %v1244_v33 }
 0x36c   : > { %v1252_v34 = vmax.f32 %v1250_v40, 0.0  ;;  %v1254_v43 = vmin.f32 %v1250_v40, 0.0 }
 0x36e   : > { %v1260_v44 = vmul.f32 %v1258_v15, %v1254_v43 }
 0x370   : > { %v1262_v7 = vadd.f32 %v1260_v44, %v1252_v34 }
 0x372   : > { %1286 = vmatpush.msra.mxu3 %v1262_v7 }
 0x374   : > { %1287 = vmatpush.msra.mxu3 %v2515_v49  ;;  %v1722_v49 = vld [vmem:[%s2141_s30 + $0x8] sm:$0xff]  ;;  %s1316_s30 = scalar_lea.sflag [#allocation5], %s2135_s10 }
 0x375   : > { %v1215_v46 = vpop.f32.mrf.mxu0 }
 0x376   : > { %v1236_v38 = vadd.f32 %v1235_v45, %v1215_v46  ;;  %1288 = vmatpush.msra.mxu3 %v1721_v50 }
 0x377   : > { %1543 = vmatmul.msk.f32.vlgmr.msra.gmra.mxu3 %vm1269_vm1, %v1264_v32 }
 0x378   : > { %v1239_v5 = vadd.f32 %v1236_v38, %v822_v48 }
 0x37a   : > { %v1245_v51 = vmul.f32 %v1242_v28, %v1239_v5 }
 0x37c   : > { %v1251_v52 = vadd.f32 %v1248_v37, %v1245_v51 }
 0x37e   : > { %v1255_v53 = vmin.f32 %v1251_v52, 0.0  ;;  %v1253_v54 = vmax.f32 %v1251_v52, 0.0 }
 0x380   : > { %v1261_v55 = vmul.f32 %v1258_v15, %v1255_v53 }
 0x382   : > { %v1263_v47 = vadd.f32 %v1261_v55, %v1253_v54 }
 0x384   : > { %1306 = vmatpush.msrb.mxu3 %v1263_v47 }
 0x386   : > { %1307 = vmatpush.msrb.mxu3 %v2535_v58 }
 0x388   : > { %1308 = vmatpush.msrb.mxu3 %v1722_v49 }
 0x389   : > { %1544 = vmatmul.msk.f32.vlgmr.msrb.gmra.mxu3 %vm1269_vm1, %v1264_v32 }
 0x3fa   : > { %v1290_v57 = vpop.f32.mrf.mxu3 }
 0x3fb   : > { %v1291_v59 = vadd.f32 %v1290_v57, %v1267_v56 }
 0x3fd   : > { %1313 = vst [vmem:[%s302_s14] sm:$0xff] %v1291_v59 }
 0x40c   : > { %v1310_v58 = vpop.f32.mrf.mxu3 }
 0x40d   : > { %v1311_v60 = vadd.f32 %v1310_v58, %v1267_v56 }
 0x40f   : > { %1314 = vst [vmem:[%s302_s14 + $0x8] sm:$0xff] %v1311_v60 }
 0x410   : > { %1900 = shalt.err (!%p1897_p9)
}
 0x411   : > { %1570 = dma.vmem_to_hbm [thread:$0]  (%p2104_p4), %s1330_s6, 256, %s1332_s17, %s1316_s30  }
 0x412 PF: > { %s1343_s10 = sand.u32 1, %s1935_s18   ;;  %p3053_p10 = scmp.ge.s32.totalorder %s1947_s21, 2 }
 0x413   : > { %s1344_s24 = scalar_lea.sflag [#allocation5], %s1343_s10 }
 0x414   : > { %p1590_p13 = pnand %p3053_p10, %p2108_p6 }
 0x416   : > { %p1591_p11 = pneg %p1590_p13 }
 0x418   : > { %1930 = dma.done.wait (%p1591_p11), %s1344_s24, 256  }
 0x419   : > { %1932 = vsyncadd (%p1591_p11), %s1344_s24, 4294967040  ;;  %p20_p0 = scmp.ge.s32.totalorder %s2078_s29, 4   ;;  %s3054_s18 = smov %s1939_s19 }
 0x41a   : > { %s3055_s19 = smov %s1943_s20  ;;  %s3056_s20 = smov %s2089_s8 }
 0x41b   : > { %s3057_s21 = smov %s2078_s29  ;;  %22 = sbr.rel (!%p20_p0) target bundleno = 7 (0x7), region = 101 }
 0x420   :  { %1350 = vsyncpa [#allocation4], 1 }
 0x421   :  { %1352 = vsyncpa [#allocation4 + $0x1], 1 }
 0x422   :  { %1353 = vsyncpa [#allocation7], 1 }
 0x423   :  { %1354 = vsyncpa [#allocation10], 1 }
 0x424   :  { %1355 = vsyncpa [#allocation5], 1 }
 0x425   :  { %1357 = vsyncpa [#allocation5 + $0x1], 1 }

</bundles_post_ra>
